<compile_context>
chip_gen: v5e
topology: v5e:2x2
jax: 0.10.0
libtpu: 0.0.40
codegen_flags: <defaults>
</compile_context>

<pallas_src>
import jax
import jax.numpy as jnp
from jax import lax
from jax.experimental import pallas as pl
from jax.experimental.pallas import tpu as pltpu


def _conv1x1_kernel(w_ref, x_ref, b_ref, o_ref):
    # w_ref: (Cout, Cin)  x_ref: (Cin, P)  b_ref: (Cout, 1)  o_ref: (Cout, P)
    acc = jnp.dot(
        w_ref[...],
        x_ref[...],
        preferred_element_type=jnp.float32,
        precision=lax.Precision.HIGHEST,
    )
    o_ref[...] = (acc + b_ref[...]).astype(o_ref.dtype)


def conv1x1_nchw(x_nchw, weight, bias):
    """1x1 conv, stride=1, padding=0.

    x_nchw: (N, Cin, H, W) float32
    weight: (Cout, Cin) float32   (PyTorch weight (Cout, Cin, 1, 1) squeezed)
    bias:   (Cout,) float32
    returns (N, Cout, H, W) float32
    """
    N, Cin, H, W = x_nchw.shape
    Cout = weight.shape[0]
    HW = H * W
    b2 = bias.reshape(Cout, 1)  # per-sublane scalar, lane-broadcast in kernel

    if N == 1:
        # Un-gridded single call: cheapest structure at this size on every
        # TPU generation (v5e/v6e/v7x); total footprint is well under the
        # scoped-VMEM default, so no vmem_limit_bytes or tiling is needed.
        x_flat = x_nchw.reshape(Cin, HW)  # free reshape of NCHW for N == 1
        out_flat = pl.pallas_call(
            _conv1x1_kernel,
            out_shape=jax.ShapeDtypeStruct((Cout, HW), x_nchw.dtype),
            in_specs=[
                pl.BlockSpec(memory_space=pltpu.MemorySpace.VMEM),
                pl.BlockSpec(memory_space=pltpu.MemorySpace.VMEM),
                pl.BlockSpec(memory_space=pltpu.MemorySpace.VMEM),
            ],
            out_specs=pl.BlockSpec(memory_space=pltpu.MemorySpace.VMEM),
            cost_estimate=pl.CostEstimate(
                flops=2 * Cout * Cin * HW,
                transcendentals=0,
                bytes_accessed=4 * (Cin * HW + Cout * Cin + Cout + Cout * HW),
            ),
        )(weight, x_flat, b2)
        return out_flat.reshape(1, Cout, H, W)

    # N > 1: grid over the batch axis; no wrapper transpose (the (N, Cin, HW)
    # and (N, Cout, HW) views are pure reshapes of NCHW).
    x_flat = x_nchw.reshape(N, Cin, HW)
    out_flat = pl.pallas_call(
        _conv1x1_kernel,
        out_shape=jax.ShapeDtypeStruct((N, Cout, HW), x_nchw.dtype),
        grid_spec=pltpu.PrefetchScalarGridSpec(
            num_scalar_prefetch=0,
            grid=(N,),
            in_specs=[
                pl.BlockSpec((Cout, Cin), lambda n: (0, 0)),
                pl.BlockSpec((pl.Squeezed(), Cin, HW), lambda n: (n, 0, 0)),
                pl.BlockSpec((Cout, 1), lambda n: (0, 0)),
            ],
            out_specs=pl.BlockSpec(
                (pl.Squeezed(), Cout, HW), lambda n: (n, 0, 0)
            ),
        ),
        # "arbitrary": do not shard this tiny grid across TensorCores (v7x).
        compiler_params=pltpu.CompilerParams(
            dimension_semantics=("arbitrary",),
        ),
        cost_estimate=pl.CostEstimate(
            flops=2 * N * Cout * Cin * HW,
            transcendentals=0,
            bytes_accessed=4 * (N * Cin * HW + Cout * Cin + Cout + N * Cout * HW),
        ),
    )(weight, x_flat, b2)
    return out_flat.reshape(N, Cout, H, W)


class Model:
    """JAX mirror of the PyTorch Model. Only conv4 affects the returned value."""

    def __init__(self, key):
        k_w, k_b = jax.random.split(key)
        Cin, Cout = 3, 64
        # PyTorch Conv2d default init: U(-bound, bound), bound = 1/sqrt(fan_in),
        # fan_in = Cin*1*1.
        bound = 1.0 / jnp.sqrt(jnp.float32(Cin))
        self.w4 = jax.random.uniform(k_w, (Cout, Cin), jnp.float32, -bound, bound)
        self.b4 = jax.random.uniform(k_b, (Cout,), jnp.float32, -bound, bound)
        # conv1/2/3/5 and bn1..bn5 are dead code for the returned value (v4);
        # they are intentionally not materialized.
        # TODO(synk): BatchNorm running-stat side effects (training mode) of the
        # dead branches are not modeled.

    def __call__(self, x1, x2):
        return conv1x1_nchw(x2, self.w4, self.b4)


def _reference(x_nchw, w, b):
    # Strict f32 reference (precision pinned to match the in-kernel matmul).
    return (
        jnp.einsum("nchw,oc->nohw", x_nchw, w, precision=lax.Precision.HIGHEST)
        + b[None, :, None, None]
    )


if __name__ == "__main__":
    key = jax.random.PRNGKey(0)
    k_model, k_x1, k_x2, k_xb = jax.random.split(key, 4)

    model = Model(k_model)

    # Shapes from the original spec: (1, 3, 32, 32).
    x1 = jax.random.normal(k_x1, (1, 3, 32, 32), jnp.float32)
    x2 = jax.random.normal(k_x2, (1, 3, 32, 32), jnp.float32)

    out = model(x1, x2)
    out = jax.block_until_ready(out)
    assert out.shape == (1, 64, 32, 32), out.shape
    assert out.dtype == jnp.float32
    ref = _reference(x2, model.w4, model.b4)
    assert jnp.allclose(out, ref, atol=1e-5, rtol=1e-5)

    # Also exercise the batched (N > 1) Squeezed-grid path at a small shape.
    xb = jax.random.normal(k_xb, (2, 3, 16, 16), jnp.float32)
    outb = model(xb, xb)
    outb = jax.block_until_ready(outb)
    assert outb.shape == (2, 64, 16, 16), outb.shape
    refb = _reference(xb, model.w4, model.b4)
    assert jnp.allclose(outb, refb, atol=1e-5, rtol=1e-5)

    print("KERNEL_OK")
</pallas_src>

<mosaic_0001>
module attributes {stable_mosaic.version = 11 : i64} {
  func.func @_conv1x1_kernel(%arg0: memref<64x3xf32, #tpu.memory_space<vmem>>, %arg1: memref<3x1024xf32, #tpu.memory_space<vmem>>, %arg2: memref<64x1xf32, #tpu.memory_space<vmem>>, %arg3: memref<64x1024xf32, #tpu.memory_space<vmem>>) attributes {dimension_semantics = [], scalar_prefetch = 0 : i64, scratch_operands = 0 : i64, tpu.core_type = #tpu.core_type<tc>} {
    %c0 = arith.constant 0 : index
    %c0_0 = arith.constant 0 : index
    %0 = vector.load %arg0[%c0, %c0_0] : memref<64x3xf32, #tpu.memory_space<vmem>>, vector<64x3xf32>
    %c0_1 = arith.constant 0 : index
    %c0_2 = arith.constant 0 : index
    %1 = vector.load %arg1[%c0_1, %c0_2] : memref<3x1024xf32, #tpu.memory_space<vmem>>, vector<3x1024xf32>
    %cst = arith.constant dense<0.000000e+00> : vector<64x1024xf32>
    %2 = tpu.matmul %0, %1, %cst {dimension_numbers = #tpu.dot_dimension_numbers<[1], [0], [0], [1], [0, 0, 1, 1], [], []>, precision = #tpu.contract_precision<fp32>} : vector<64x3xf32>, vector<3x1024xf32>, vector<64x1024xf32> -> vector<64x1024xf32>
    %c0_3 = arith.constant 0 : index
    %c0_4 = arith.constant 0 : index
    %3 = vector.load %arg2[%c0_3, %c0_4] : memref<64x1xf32, #tpu.memory_space<vmem>>, vector<64x1xf32>
    %4 = vector.broadcast %3 : vector<64x1xf32> to vector<64x1024xf32>
    %5 = arith.addf %2, %4 : vector<64x1024xf32>
    %c0_5 = arith.constant 0 : index
    %c0_6 = arith.constant 0 : index
    %6 = vector.load %arg3[%c0_5, %c0_6] : memref<64x1024xf32, #tpu.memory_space<vmem>>, vector<64x1024xf32>
    tpu.vector_store %arg3[%c0_5, %c0_6], %5 {strides = array<i32>} : memref<64x1024xf32, #tpu.memory_space<vmem>>, vector<64x1024xf32>,
    return
  }
}

</mosaic_0001>

<bundles_post_ra>
// kernel: tpu_custom_call.1
= control target key start
LH: loop header
LB: loop body
LE: loop exit
PB: predicated region body
PF: predicated region fallthrough
CT: control target
= control target key end

     0   :  { %vm94_vm0 = vcmask 23552   ;;  %v3155_v7 = vmov 0   ;;  %s4367_s0 = inlined_call_operand.vmem [shape: f32[64,3], index: 0, kind: input, shape index: {}]   ;;  %s4368_s1 = inlined_call_operand.vmem [shape: f32[3,1024], index: 1, kind: input, shape index: {}]   ;;  %s4369_s2 = inlined_call_operand.vmem [shape: f32[64,1], index: 2, kind: input, shape index: {}]   ;;  %s4370_s3 = inlined_call_operand.hbm [shape: f32[64,1024], index: 3, kind: output, shape index: {}]  }
   0x1   :  { %v23_v0 = vld [vmem:[%s4368_s1] sm:$0x77]  ;;  %v16_v2 = vld [vmem:[%s4367_s0 + $0x8] sm:$0xff]  ;;  %3126 = vset.pattern.permute.xlu0 %v3155_v7  ;;  %3127 = vset.pattern.permute.xlu1 %v3155_v7  ;;  %v17_v9 = vld [vmem:[%s4367_s0 + $0x10] sm:$0xff] }
   0x2   :  { %v15_v1 = vld [vmem:[%s4367_s0] sm:$0xff]  ;;  %79 = vst [vmem:[#allocation1] ss:$2 sm:$0xff] %v23_v0  ;;  %v99_v4 = vsel %vm94_vm0, %v16_v2, 0  ;;  %3128 = vset.pattern.permute.xlu2 %v3155_v7 }
   0x3   :  { %v96_v3 = vsel %vm94_vm0, %v15_v1, 0  ;;  %v3192_v6 = vand.u32 4294901760, %v99_v4  ;;  %v27_v8 = vld [vmem:[%s4369_s2] sm:$0xff] }
   0x4   :  { %v3190_v5 = vand.u32 4294901760, %v96_v3  ;;  %37 = vperm.xlu0 %3126, %v27_v8  }
   0x5   :  { %8 = vsyncpa [#allocation3], 0  ;;  %v3204_v11 = vsub.f32 %v99_v4, %v3192_v6  ;;  %vm119_vm1 = vcmask 1042432   ;;  %v102_v13 = vsel %vm94_vm0, %v17_v9, 0  ;;  %v28_v14 = vld [vmem:[%s4369_s2 + $0x8] sm:$0xff]  ;;  %v18_v25 = vld [vmem:[%s4367_s0 + $0x18] sm:$0xff] }
   0x6   :  { %v3201_v10 = vsub.f32 %v96_v3, %v3190_v5  ;;  %v3220_v21 = vand.u32 4294901760, %v102_v13  ;;  %v29_v30 = vld [vmem:[%s4369_s2 + $0x10] sm:$0xff]  ;;  %v105_v33 = vsel %vm94_vm0, %v18_v25, 0  ;;  %v19_v41 = vld [vmem:[%s4367_s0 + $0x20] sm:$0xff]  ;;  %v30_v44 = vld [vmem:[%s4369_s2 + $0x18] sm:$0xff]  ;;  %s3110_s26 = sshll.u32 %s4370_s3, 4  ;;  %s3111_s26 = int_to_ptr.hbm [resolvable:$true] %s3110_s26 }
   0x7   :  { %v3218_v20 = vand.u32 4294901760, %v3204_v11  ;;  %47 = vperm.xlu1 %3127, %v29_v30   ;;  %v3244_v38 = vand.u32 4294901760, %v105_v33  ;;  %v108_v45 = vsel %vm94_vm0, %v19_v41, 0  ;;  %v20_v49 = vld [vmem:[%s4367_s0 + $0x28] sm:$0xff]  ;;  %v21_v56 = vld [vmem:[%s4367_s0 + $0x30] sm:$0xff]  ;;  %v22_v63 = vld [vmem:[%s4367_s0 + $0x38] sm:$0xff] }
   0x8   :  { %v3207_v12 = vand.u32 4294901760, %v3201_v10  ;;  %v3232_v29 = vsub.f32 %v102_v13, %v3220_v21  ;;  %v3267_v48 = vand.u32 4294901760, %v108_v45  ;;  %v111_v52 = vsel %vm94_vm0, %v20_v49, 0  ;;  %v33_v2 = vld [vmem:[%s4369_s2 + $0x30] sm:$0xff]  ;;  %s3157_s27 = smov 1024   ;;  %s3158_s28 = smov 64  }
   0x9   :  { %v86_v15 = vld.sshfl [vmem:[#allocation1] sm:$0xff pattern:$0x75316420]  ;;  %v87_v17 = vld.sshfl [vmem:[#allocation1 + $0x8] sm:$0xff pattern:$0x75316420]  ;;  %v164_v28 = vsub.f32 %v3204_v11, %v3218_v20  ;;  %v3254_v43 = vsub.f32 %v105_v33, %v3244_v38 }
   0xa   :  { %4431 = vst [vmem:[#allocation5_spill] sm:$0xff] %v3207_v12  ;;  %v156_v16 = vsub.f32 %v3201_v10, %v3207_v12  ;;  %v120_v18 = vsel %vm119_vm1, %v86_v15, 0  ;;  %v122_v19 = vsel %vm119_vm1, %v87_v17, 0  ;;  %v3242_v37 = vand.u32 4294901760, %v3232_v29  ;;  %v34_v15 = vld [vmem:[%s4369_s2 + $0x38] sm:$0xff] }
   0xb   :  { %v151_v22 = vand.u32 4294901760, %v120_v18  ;;  %v514_v24 = vand.u32 4294901760, %v122_v19  ;;  %v3239_v36 = vand.u32 4294901760, %v164_v28  ;;  %v3265_v47 = vand.u32 4294901760, %v3254_v43  ;;  %4433 = vst [vmem:[#allocation7_spill] sm:$0xff] %v3267_v48 }
   0xc   :  { %v3222_v23 = vand.u32 4294901760, %v156_v16  ;;  %42 = vperm.xlu0 %3126, %v28_v14   ;;  %v172_v42 = vsub.f32 %v3232_v29, %v3242_v37  ;;  %v3277_v51 = vsub.f32 %v108_v45, %v3267_v48  ;;  %v3287_v55 = vand.u32 4294901760, %v111_v52  ;;  %v31_v14 = vld [vmem:[%s4369_s2 + $0x20] sm:$0xff] }
   0xd   :  { %152 = vmatpush.msra.mxu0 %v151_v22  ;;  %v234_v26 = vsub.f32 %v120_v18, %v151_v22  ;;  %347 = vmatpush.msra.mxu3 %v151_v22  ;;  %v597_v27 = vsub.f32 %v122_v19, %v514_v24  ;;  %v180_v50 = vsub.f32 %v3254_v43, %v3265_v47  ;;  %v114_v59 = vsel %vm94_vm0, %v21_v56, 0  ;;  %v32_v19 = vld [vmem:[%s4369_s2 + $0x28] sm:$0xff] }
   0xe   :  { %4432 = vst [vmem:[#allocation6_spill] sm:$0xff] %v3222_v23  ;;  %158 = vmatmul.f32.vlgmr.msra.gmra.mxu0 %v3222_v23  ;;  %351 = vmatmul.f32.vlgmr.msra.gmra.mxu3 %v3207_v12  ;;  %v3262_v46 = vand.u32 4294901760, %v172_v42  ;;  %v3285_v54 = vand.u32 4294901760, %v3277_v51  ;;  %v3297_v58 = vsub.f32 %v111_v52, %v3287_v55  ;;  %v3307_v62 = vand.u32 4294901760, %v114_v59 }
   0xf   :  { %289 = vmatpush.msra.mxu2 %v234_v26  ;;  %v235_v31 = vand.u32 4294901760, %v234_v26  ;;  %v598_v32 = vand.u32 4294901760, %v597_v27  ;;  %52 = vperm.xlu1 %3127, %v30_v44   ;;  %v3282_v53 = vand.u32 4294901760, %v180_v50  ;;  %4434 = vst [vmem:[#allocation8_spill] sm:$0xff] %v3287_v55  ;;  %v117_v3 = vsel %vm94_vm0, %v22_v63, 0 }
  0x10   :  { %292 = vmatmul.f32.vlgmr.msra.gmra.mxu2 %v3201_v10  ;;  %v188_v57 = vsub.f32 %v3277_v51, %v3285_v54  ;;  %4435 = vst [vmem:[#allocation9_spill] sm:$0xff] %v3297_v58  ;;  %v3305_v61 = vand.u32 4294901760, %v3297_v58  ;;  %v3317_v1 = vsub.f32 %v114_v59, %v3307_v62  ;;  %v3330_v8 = vand.u32 4294901760, %v117_v3  ;;  %57 = vperm.xlu2 %3128, %v31_v14  }
  0x11   :  { %515 = vmatpush.msrb.mxu2 %v514_v24  ;;  %v236_v34 = vsub.f32 %v234_v26, %v235_v31  ;;  %415 = vmatpush.msrb.mxu0 %v235_v31  ;;  %v599_v35 = vsub.f32 %v597_v27, %v598_v32  ;;  %4436 = vst [vmem:[#allocation10_spill] sm:$0xff] %v3307_v62 }
  0x12   :  { %v3302_v60 = vand.u32 4294901760, %v188_v57  ;;  %v196_v0 = vsub.f32 %v3297_v58, %v3305_v61  ;;  %4437 = vst [vmem:[#allocation11_spill] sm:$0xff] %v3317_v1  ;;  %v3328_v7 = vand.u32 4294901760, %v3317_v1  ;;  %v3337_v13 = vsub.f32 %v117_v3, %v3330_v8 }
  0x13   :  { %778 = vmatpush.msra.mxu2 %v598_v32  ;;  %652 = vmatpush.msra.mxu0 %v597_v27  ;;  %v237_v39 = vand.u32 4294901760, %v236_v34  ;;  %v600_v40 = vand.u32 4294901760, %v599_v35  ;;  %4440 = vst [vmem:[#allocation14_spill] sm:$0xff] %v3330_v8 }
  0x14   :  { %67 = vperm.xlu0 %3126, %v33_v2   ;;  %v3325_v4 = vand.u32 4294901760, %v196_v0  ;;  %4439 = vst [vmem:[#allocation13_spill] sm:$0xff] %v3328_v7  ;;  %v204_v9 = vsub.f32 %v3317_v1, %v3328_v7  ;;  %v3350_v17 = vand.u32 4294901760, %v3337_v13 }
  0x15   :  { %238 = vmatpush.msra.mxu1 %v237_v39  ;;  %601 = vmatpush.msrb.mxu3 %v600_v40  ;;  %4441 = vst [vmem:[#allocation15_spill] sm:$0xff] %v3337_v13 }
  0x16   :  { %166 = vmatmul.f32.gmra.mxu0 %v3239_v36  ;;  %240 = vmatmul.f32.vlgmr.msra.gmra.mxu1 %v3190_v5  ;;  %4438 = vst [vmem:[#allocation12_spill] sm:$0xff] %v3325_v4  ;;  %v3347_v16 = vand.u32 4294901760, %v204_v9  ;;  %v212_v18 = vsub.f32 %v3337_v13, %v3350_v17 }
  0x17   :  { %465 = vmatpush.msrb.mxu1 %v151_v22  ;;  %357 = vmatmul.f32.gmra.mxu3 %v3218_v20  ;;  %4443 = vst [vmem:[#allocation17_spill] sm:$0xff] %v3350_v17 }
  0x18   :  { %297 = vmatmul.f32.gmra.mxu2 %v3204_v11  ;;  %828 = vmatpush.msra.mxu3 %v514_v24  ;;  %4442 = vst [vmem:[#allocation16_spill] sm:$0xff] %v3347_v16  ;;  %v3361_v22 = vand.u32 4294901760, %v212_v18 }
  0x19   :  { %710 = vmatpush.msra.mxu1 %v514_v24  ;;  %72 = vperm.xlu1 %3127, %v34_v15   ;;  %v24_v24 = vld [vmem:[%s4368_s1 + $0x8] sm:$0x77] }
  0x1a   :  { %62 = vperm.xlu2 %3128, %v32_v19   ;;  %4444 = vst [vmem:[#allocation18_spill] sm:$0xff] %v3361_v22 }
  0x1b   :  { %81 = vst [vmem:[#allocation1 + $0x10] ss:$2 sm:$0xff] %v24_v24 }
  0x1e   :  { %174 = vmatmul.f32.gmra.mxu0 %v3262_v46  ;;  %244 = vmatmul.f32.gmra.mxu1 %v3192_v6 }
  0x1f   :  { %363 = vmatmul.f32.gmra.mxu3 %v3242_v37 }
  0x20   :  { %302 = vmatmul.f32.gmra.mxu2 %v3232_v29 }
  0x22   :  { %v88_v25 = vld.sshfl [vmem:[#allocation1 + $0x10] sm:$0xff pattern:$0x75316420]  ;;  %v89_v15 = vld.sshfl [vmem:[#allocation1 + $0x18] sm:$0xff pattern:$0x75316420] }
  0x23   :  { %v124_v26 = vsel %vm119_vm1, %v88_v25, 0  ;;  %v126_v18 = vsel %vm119_vm1, %v89_v15, 0 }
  0x24   :  { %v877_v27 = vand.u32 4294901760, %v124_v26  ;;  %v1240_v19 = vand.u32 4294901760, %v126_v18 }
  0x26   :  { %182 = vmatmul.f32.gmra.mxu0 %v3282_v53  ;;  %248 = vmatmul.f32.gmra.mxu1 %v3220_v21  ;;  %v960_v28 = vsub.f32 %v124_v26, %v877_v27  ;;  %v1323_v25 = vsub.f32 %v126_v18, %v1240_v19 }
  0x27   :  { %369 = vmatmul.f32.gmra.mxu3 %v3265_v47 }
  0x28   :  { %307 = vmatmul.f32.gmra.mxu2 %v3254_v43  ;;  %v961_v30 = vand.u32 4294901760, %v960_v28 }
  0x2a   :  { %v962_v31 = vsub.f32 %v960_v28, %v961_v30 }
  0x2c   :  { %v963_v32 = vand.u32 4294901760, %v962_v31 }
  0x2e   :  { %190 = vmatmul.f32.gmra.mxu0 %v3302_v60  ;;  %252 = vmatmul.f32.gmra.mxu1 %v3244_v38 }
  0x2f   :  { %375 = vmatmul.f32.gmra.mxu3 %v3285_v54 }
  0x30   :  { %312 = vmatmul.f32.gmra.mxu2 %v3277_v51 }
  0x36   :  { %198 = vmatmul.f32.gmra.mxu0 %v3325_v4  ;;  %256 = vmatmul.f32.gmra.mxu1 %v3267_v48 }
  0x37   :  { %381 = vmatmul.f32.gmra.mxu3 %v3305_v61 }
  0x38   :  { %317 = vmatmul.f32.gmra.mxu2 %v3297_v58 }
  0x3e   :  { %206 = vmatmul.f32.gmra.mxu0 %v3347_v16  ;;  %260 = vmatmul.f32.gmra.mxu1 %v3287_v55 }
  0x3f   :  { %387 = vmatmul.f32.gmra.mxu3 %v3328_v7 }
  0x40   :  { %322 = vmatmul.f32.gmra.mxu2 %v3317_v1 }
  0x46   :  { %214 = vmatmul.f32.gmra.mxu0 %v3361_v22  ;;  %264 = vmatmul.f32.gmra.mxu1 %v3307_v62 }
  0x47   :  { %393 = vmatmul.f32.gmra.mxu3 %v3350_v17 }
  0x48   :  { %327 = vmatmul.f32.gmra.mxu2 %v3337_v13 }
  0x4e   :  { %268 = vmatmul.f32.gmra.mxu1 %v3330_v8  ;;  %417 = vmatmul.f32.vlgmr.msrb.gmra.mxu0 %v3190_v5 }
  0x4f   :  { %603 = vmatmul.f32.vlgmr.msrb.gmra.mxu3 %v3190_v5  ;;  %878 = vmatpush.msrb.mxu0 %v877_v27 }
  0x50   :  { %521 = vmatmul.f32.vlgmr.msrb.gmra.mxu2 %v3222_v23  ;;  %1073 = vmatpush.msrb.mxu3 %v877_v27 }
  0x51   :  { %1015 = vmatpush.msrb.mxu2 %v960_v28 }
  0x56   :  { %421 = vmatmul.f32.gmra.mxu0 %v3192_v6  ;;  %467 = vmatmul.f32.vlgmr.msrb.gmra.mxu1 %v3190_v5 }
  0x57   :  { %607 = vmatmul.f32.gmra.mxu3 %v3192_v6  ;;  %964 = vmatpush.msrb.mxu1 %v963_v32 }
  0x58   :  { %529 = vmatmul.f32.gmra.mxu2 %v3239_v36 }
  0x5e   :  { %425 = vmatmul.f32.gmra.mxu0 %v3220_v21  ;;  %471 = vmatmul.f32.gmra.mxu1 %v3192_v6 }
  0x5f   :  { %611 = vmatmul.f32.gmra.mxu3 %v3220_v21 }
  0x60   :  { %537 = vmatmul.f32.gmra.mxu2 %v3262_v46 }
  0x66   :  { %429 = vmatmul.f32.gmra.mxu0 %v3244_v38  ;;  %475 = vmatmul.f32.gmra.mxu1 %v3220_v21 }
  0x67   :  { %615 = vmatmul.f32.gmra.mxu3 %v3244_v38 }
  0x68   :  { %545 = vmatmul.f32.gmra.mxu2 %v3282_v53 }
  0x6e   :  { %433 = vmatmul.f32.gmra.mxu0 %v3267_v48  ;;  %479 = vmatmul.f32.gmra.mxu1 %v3244_v38 }
  0x6f   :  { %619 = vmatmul.f32.gmra.mxu3 %v3267_v48 }
  0x70   :  { %553 = vmatmul.f32.gmra.mxu2 %v3302_v60 }
  0x76   :  { %437 = vmatmul.f32.gmra.mxu0 %v3287_v55  ;;  %483 = vmatmul.f32.gmra.mxu1 %v3267_v48  ;;  %v3480_v32 = vpop.permute.xlu0 %37 }
  0x77   :  { %623 = vmatmul.f32.gmra.mxu3 %v3287_v55  ;;  %4445 = vst [vmem:[#allocation19_spill] sm:$0xff] %v3480_v32 }
  0x78   :  { %561 = vmatmul.f32.gmra.mxu2 %v3325_v4 }
  0x7e   :  { %441 = vmatmul.f32.gmra.mxu0 %v3307_v62  ;;  %487 = vmatmul.f32.gmra.mxu1 %v3287_v55 }
  0x7f   :  { %627 = vmatmul.f32.gmra.mxu3 %v3307_v62 }
  0x80   :  { %569 = vmatmul.f32.gmra.mxu2 %v3347_v16 }
  0x86   :  { %445 = vmatmul.f32.gmra.mxu0 %v3330_v8  ;;  %491 = vmatmul.f32.gmra.mxu1 %v3307_v62 }
  0x87   :  { %631 = vmatmul.f32.gmra.mxu3 %v3330_v8 }
  0x88   :  { %577 = vmatmul.f32.gmra.mxu2 %v3361_v22 }
  0x8b   :  { %v3403_v33 = vpop.f32.mrf.mxu0 }
  0x8e   :  { %495 = vmatmul.f32.gmra.mxu1 %v3330_v8  ;;  %655 = vmatmul.f32.vlgmr.msra.gmra.mxu0 %v3201_v10 }
  0x8f   :  { %830 = vmatmul.f32.vlgmr.msra.gmra.mxu3 %v3190_v5  ;;  %1141 = vmatpush.msra.mxu0 %v961_v30  ;;  %v1324_v30 = vand.u32 4294901760, %v1323_v25 }
  0x90   :  { %780 = vmatmul.f32.vlgmr.msra.gmra.mxu2 %v3190_v5 }
  0x91   :  { %v3409_v34 = vpop.f32.mrf.mxu3  ;;  %1241 = vmatpush.msra.mxu2 %v1240_v19  ;;  %v1325_v31 = vsub.f32 %v1323_v25, %v1324_v30 }
  0x93   :  { %v3411_v35 = vpop.f32.mrf.mxu0  ;;  %v3413_v39 = vpop.f32.mrf.mxu1  ;;  %v1326_v15 = vand.u32 4294901760, %v1325_v31 }
  0x94   :  { %v3415_v40 = vpop.f32.mrf.mxu2 }
  0x95   :  { %1327 = vmatpush.msra.mxu3 %v1326_v15  ;;  %v3499_v15 = vpop.permute.xlu0 %42 }
  0x96   :  { %660 = vmatmul.f32.gmra.mxu0 %v3204_v11  ;;  %714 = vmatmul.f32.vlgmr.msra.gmra.mxu1 %v3207_v12  ;;  %4448 = vst [vmem:[#allocation22_spill] sm:$0xff] %v3499_v15 }
  0x97   :  { %834 = vmatmul.f32.gmra.mxu3 %v3192_v6  ;;  %1191 = vmatpush.msra.mxu1 %v877_v27 }
  0x98   :  { %784 = vmatmul.f32.gmra.mxu2 %v3192_v6 }
  0x9a   :  { %v3421_v41 = vpop.f32.mrf.mxu3 }
  0x9b   :  { %v3423_v42 = vpop.f32.mrf.mxu0  ;;  %v3425_v44 = vpop.f32.mrf.mxu1 }
  0x9c   :  { %v3427_v45 = vpop.f32.mrf.mxu2 }
  0x9e   :  { %665 = vmatmul.f32.gmra.mxu0 %v3232_v29  ;;  %720 = vmatmul.f32.gmra.mxu1 %v3218_v20 }
  0x9f   :  { %838 = vmatmul.f32.gmra.mxu3 %v3220_v21 }
  0xa0   :  { %788 = vmatmul.f32.gmra.mxu2 %v3220_v21 }
  0xa2   :  { %v3433_v49 = vpop.f32.mrf.mxu3 }
  0xa3   :  { %v3435_v50 = vpop.f32.mrf.mxu0  ;;  %v3437_v52 = vpop.f32.mrf.mxu1 }
  0xa4   :  { %v3439_v56 = vpop.f32.mrf.mxu2 }
  0xa6   :  { %670 = vmatmul.f32.gmra.mxu0 %v3254_v43  ;;  %726 = vmatmul.f32.gmra.mxu1 %v3242_v37 }
  0xa7   :  { %842 = vmatmul.f32.gmra.mxu3 %v3244_v38 }
  0xa8   :  { %792 = vmatmul.f32.gmra.mxu2 %v3244_v38 }
  0xaa   :  { %v3445_v57 = vpop.f32.mrf.mxu3 }
  0xab   :  { %v3447_v59 = vpop.f32.mrf.mxu0  ;;  %v3449_v63 = vpop.f32.mrf.mxu1 }
  0xac   :  { %v3451_v0 = vpop.f32.mrf.mxu2 }
  0xae   :  { %675 = vmatmul.f32.gmra.mxu0 %v3277_v51  ;;  %732 = vmatmul.f32.gmra.mxu1 %v3265_v47 }
  0xaf   :  { %846 = vmatmul.f32.gmra.mxu3 %v3267_v48 }
  0xb0   :  { %796 = vmatmul.f32.gmra.mxu2 %v3267_v48 }
  0xb2   :  { %v3457_v2 = vpop.f32.mrf.mxu3 }
  0xb3   :  { %v3459_v3 = vpop.f32.mrf.mxu0  ;;  %v3461_v9 = vpop.f32.mrf.mxu1 }
  0xb4   :  { %v3463_v14 = vpop.f32.mrf.mxu2 }
  0xb6   :  { %680 = vmatmul.f32.gmra.mxu0 %v3297_v58  ;;  %738 = vmatmul.f32.gmra.mxu1 %v3285_v54 }
  0xb7   :  { %850 = vmatmul.f32.gmra.mxu3 %v3287_v55 }
  0xb8   :  { %800 = vmatmul.f32.gmra.mxu2 %v3287_v55 }
  0xba   :  { %v3470_v24 = vpop.f32.mrf.mxu3 }
  0xbb   :  { %v3472_v26 = vpop.f32.mrf.mxu0  ;;  %v3474_v27 = vpop.f32.mrf.mxu1 }
  0xbc   :  { %v3476_v28 = vpop.f32.mrf.mxu2 }
  0xbe   :  { %685 = vmatmul.f32.gmra.mxu0 %v3317_v1  ;;  %744 = vmatmul.f32.gmra.mxu1 %v3305_v61  ;;  %v160_v1 = vadd.f32 %v3403_v33, %v3480_v32  ;;  %v168_v32 = vadd.f32 %v3411_v35, %v3499_v15 }
  0xbf   :  { %854 = vmatmul.f32.gmra.mxu3 %v3307_v62 }
  0xc0   :  { %804 = vmatmul.f32.gmra.mxu2 %v3307_v62  ;;  %v242_v31 = vadd.f32 %v3413_v39, %v160_v1  ;;  %v3512_v1 = vpop.permute.xlu1 %47 }
  0xc2   :  { %v3484_v18 = vpop.f32.mrf.mxu3  ;;  %v294_v33 = vadd.f32 %v3415_v40, %v242_v31 }
  0xc3   :  { %4446 = vst [vmem:[#allocation20_spill] sm:$0xff] %v3484_v18  ;;  %v3486_v22 = vpop.f32.mrf.mxu0  ;;  %v3488_v55 = vpop.f32.mrf.mxu1 }
  0xc4   :  { %4447 = vst [vmem:[#allocation21_spill] sm:$0xff] %v3486_v22  ;;  %v3492_v16 = vpop.f32.mrf.mxu2  ;;  %v353_v39 = vadd.f32 %v3409_v34, %v294_v33 }
  0xc6   :  { %690 = vmatmul.f32.gmra.mxu0 %v3337_v13  ;;  %750 = vmatmul.f32.gmra.mxu1 %v3328_v7 }
  0xc7   :  { %858 = vmatmul.f32.gmra.mxu3 %v3330_v8 }
  0xc8   :  { %808 = vmatmul.f32.gmra.mxu2 %v3330_v8  ;;  %v246_v8 = vadd.f32 %v3425_v44, %v168_v32 }
  0xca   :  { %v3501_v62 = vpop.f32.mrf.mxu3 }
  0xcb   :  { %4449 = vst [vmem:[#allocation23_spill] sm:$0xff] %v3501_v62  ;;  %v3503_v18 = vpop.f32.mrf.mxu1  ;;  %v418_v22 = vpop.f32.mrf.mxu0  ;;  %v176_v62 = vadd.f32 %v3423_v42, %v3512_v1 }
  0xcc   :  { %v3508_v13 = vpop.f32.mrf.mxu2  ;;  %v419_v35 = vadd.f32 %v418_v22, %v353_v39 }
  0xcd   :  { %v250_v34 = vadd.f32 %v3437_v52, %v176_v62 }
  0xce   :  { %756 = vmatmul.f32.gmra.mxu1 %v3350_v17  ;;  %884 = vmatmul.f32.vlgmr.msrb.gmra.mxu0 %v3222_v23  ;;  %v299_v23 = vadd.f32 %v3427_v45, %v246_v8  ;;  %v3531_v8 = vpop.permute.xlu1 %52 }
  0xcf   :  { %1077 = vmatmul.f32.vlgmr.msrb.gmra.mxu3 %v3207_v12  ;;  %1378 = vmatpush.msrb.mxu0 %v1323_v25  ;;  %v184_v32 = vadd.f32 %v3435_v50, %v3531_v8 }
  0xd0   :  { %1018 = vmatmul.f32.vlgmr.msrb.gmra.mxu2 %v3201_v10  ;;  %1554 = vmatpush.msrb.mxu3 %v1240_v19  ;;  %v359_v22 = vadd.f32 %v3421_v41, %v299_v23  ;;  %v3542_v23 = vpop.permute.xlu2 %57 }
  0xd1   :  { %1504 = vmatpush.msrb.mxu2 %v1324_v30  ;;  %v304_v30 = vadd.f32 %v3439_v56, %v250_v34  ;;  %v254_v41 = vadd.f32 %v3449_v63, %v184_v32 }
  0xd2   :  { %v3518_v40 = vpop.f32.mrf.mxu3 }
  0xd3   :  { %v422_v31 = vpop.f32.mrf.mxu0  ;;  %v468_v15 = vpop.f32.mrf.mxu1  ;;  %v365_v62 = vadd.f32 %v3433_v49, %v304_v30  ;;  %v309_v39 = vadd.f32 %v3451_v0, %v254_v41 }
  0xd4   :  { %v469_v12 = vadd.f32 %v468_v15, %v419_v35  ;;  %v3523_v25 = vpop.f32.mrf.mxu2  ;;  %v423_v42 = vadd.f32 %v422_v31, %v359_v22  ;;  %v192_v35 = vadd.f32 %v3447_v59, %v3542_v23 }
  0xd5   :  { %v371_v49 = vadd.f32 %v3445_v57, %v309_v39 }
  0xd6   :  { %3040 = vst [vmem:[#allocation2] sm:$0xff] %v469_v12  ;;  %892 = vmatmul.f32.gmra.mxu0 %v3239_v36  ;;  %966 = vmatmul.f32.vlgmr.msrb.gmra.mxu1 %v3190_v5  ;;  %v258_v63 = vadd.f32 %v3461_v9, %v192_v35 }
  0xd7   :  { %1083 = vmatmul.f32.gmra.mxu3 %v3218_v20  ;;  %1436 = vmatpush.msrb.mxu1 %v1240_v19 }
  0xd8   :  { %1023 = vmatmul.f32.gmra.mxu2 %v3204_v11  ;;  %v3561_v0 = vpop.permute.xlu2 %62 }
  0xd9   :  { %v200_v30 = vadd.f32 %v3459_v3, %v3561_v0 }
  0xda   :  { %v3533_v44 = vpop.f32.mrf.mxu3 }
  0xdb   :  { %v426_v45 = vpop.f32.mrf.mxu0  ;;  %v472_v12 = vpop.f32.mrf.mxu1  ;;  %v262_v9 = vadd.f32 %v3474_v27, %v200_v30 }
  0xdc   :  { %v473_v15 = vadd.f32 %v472_v12, %v423_v42  ;;  %v3538_v19 = vpop.f32.mrf.mxu2  ;;  %v427_v52 = vadd.f32 %v426_v45, %v365_v62  ;;  %v314_v12 = vadd.f32 %v3463_v14, %v258_v63  ;;  %v3576_v14 = vpop.permute.xlu0 %67 }
  0xde   :  { %3048 = vst [vmem:[#allocation2 + $0x40] sm:$0xff] %v473_v15  ;;  %900 = vmatmul.f32.gmra.mxu0 %v3262_v46  ;;  %970 = vmatmul.f32.gmra.mxu1 %v3192_v6  ;;  %v377_v57 = vadd.f32 %v3457_v2, %v314_v12 }
  0xdf   :  { %1089 = vmatmul.f32.gmra.mxu3 %v3242_v37 }
  0xe0   :  { %1028 = vmatmul.f32.gmra.mxu2 %v3232_v29 }
  0xe2   :  { %v3548_v50 = vpop.f32.mrf.mxu3 }
  0xe3   :  { %v430_v56 = vpop.f32.mrf.mxu0  ;;  %v476_v33 = vpop.f32.mrf.mxu1 }
  0xe4   :  { %v477_v31 = vadd.f32 %v476_v33, %v427_v52  ;;  %v3553_v22 = vpop.f32.mrf.mxu2  ;;  %v431_v34 = vadd.f32 %v430_v56, %v371_v49  ;;  %v319_v56 = vadd.f32 %v3476_v28, %v262_v9  ;;  %v208_v33 = vadd.f32 %v3472_v26, %v3576_v14  ;;  %v3591_v28 = vpop.permute.xlu1 %72 }
  0xe5   :  { %4450 = vst [vmem:[#allocation24_spill] sm:$0xff] %v3591_v28 }
  0xe6   :  { %3056 = vst [vmem:[#allocation2 + $0x80] sm:$0xff] %v477_v31  ;;  %908 = vmatmul.f32.gmra.mxu0 %v3282_v53  ;;  %974 = vmatmul.f32.gmra.mxu1 %v3220_v21  ;;  %v383_v2 = vadd.f32 %v3470_v24, %v319_v56  ;;  %v266_v27 = vadd.f32 %v3488_v55, %v208_v33  ;;  %v4452_v24 = vld [vmem:[#allocation16_spill] sm:$0xff] }
  0xe7   :  { %1095 = vmatmul.f32.gmra.mxu3 %v3265_v47  ;;  %v4453_v55 = vld [vmem:[#allocation8_spill] sm:$0xff] }
  0xe8   :  { %1033 = vmatmul.f32.gmra.mxu2 %v3254_v43 }
  0xea   :  { %v3563_v59 = vpop.f32.mrf.mxu3 }
  0xeb   :  { %v434_v42 = vpop.f32.mrf.mxu0  ;;  %v480_v45 = vpop.f32.mrf.mxu1 }
  0xec   :  { %v481_v32 = vadd.f32 %v480_v45, %v431_v34  ;;  %v3568_v15 = vpop.f32.mrf.mxu2  ;;  %v435_v62 = vadd.f32 %v434_v42, %v377_v57  ;;  %v324_v34 = vadd.f32 %v3492_v16, %v266_v27  ;;  %v4451_v42 = vld [vmem:[#allocation21_spill] sm:$0xff]  ;;  %v4456_v27 = vld [vmem:[#allocation18_spill] sm:$0xff] }
  0xed   :  { %v216_v45 = vadd.f32 %v4451_v42, %v3591_v28 }
  0xee   :  { %3064 = vst [vmem:[#allocation2 + $0xc0] sm:$0xff] %v481_v32  ;;  %916 = vmatmul.f32.gmra.mxu0 %v3302_v60  ;;  %978 = vmatmul.f32.gmra.mxu1 %v3244_v38  ;;  %v4454_v32 = vld [vmem:[#allocation20_spill] sm:$0xff] }
  0xef   :  { %1101 = vmatmul.f32.gmra.mxu3 %v3285_v54  ;;  %v389_v57 = vadd.f32 %v4454_v32, %v324_v34  ;;  %v270_v9 = vadd.f32 %v3503_v18, %v216_v45  ;;  %v4458_v18 = vld [vmem:[#allocation23_spill] sm:$0xff] }
  0xf0   :  { %1038 = vmatmul.f32.gmra.mxu2 %v3277_v51  ;;  %v4459_v34 = vld [vmem:[#allocation15_spill] sm:$0xff] }
  0xf1   :  { %v329_v33 = vadd.f32 %v3508_v13, %v270_v9  ;;  %v4460_v13 = vld [vmem:[#allocation19_spill] sm:$0xff] }
  0xf2   :  { %v3578_v3 = vpop.f32.mrf.mxu3  ;;  %v523_v32 = vadd.f32 %v3523_v25, %v4460_v13 }
  0xf3   :  { %v438_v41 = vpop.f32.mrf.mxu0  ;;  %v484_v52 = vpop.f32.mrf.mxu1 }
  0xf4   :  { %v485_v39 = vadd.f32 %v484_v52, %v435_v62  ;;  %v3583_v35 = vpop.f32.mrf.mxu2  ;;  %v439_v31 = vadd.f32 %v438_v41, %v383_v2  ;;  %v4455_v62 = vld [vmem:[#allocation11_spill] sm:$0xff] }
  0xf6   :  { %3072 = vst [vmem:[#allocation2 + $0x100] sm:$0xff] %v485_v39  ;;  %924 = vmatmul.f32.gmra.mxu0 %v3325_v4  ;;  %982 = vmatmul.f32.gmra.mxu1 %v3267_v48 }
  0xf7   :  { %1107 = vmatmul.f32.gmra.mxu3 %v3305_v61 }
  0xf8   :  { %1043 = vmatmul.f32.gmra.mxu2 %v3297_v58 }
  0xfa   :  { %v3593_v26 = vpop.f32.mrf.mxu3 }
  0xfb   :  { %v442_v49 = vpop.f32.mrf.mxu0  ;;  %v488_v63 = vpop.f32.mrf.mxu1 }
  0xfc   :  { %v489_v12 = vadd.f32 %v488_v63, %v439_v31  ;;  %v3598_v30 = vpop.f32.mrf.mxu2  ;;  %v443_v16 = vadd.f32 %v442_v49, %v389_v57  ;;  %v4457_v31 = vld [vmem:[#allocation10_spill] sm:$0xff]  ;;  %v395_v63 = vadd.f32 %v4458_v18, %v329_v33 }
  0xfe   :  { %3080 = vst [vmem:[#allocation2 + $0x140] sm:$0xff] %v489_v12  ;;  %932 = vmatmul.f32.gmra.mxu0 %v4452_v24  ;;  %986 = vmatmul.f32.gmra.mxu1 %v4453_v55 }
  0xff   :  { %1113 = vmatmul.f32.gmra.mxu3 %v3328_v7 }
 0x100   :  { %1048 = vmatmul.f32.gmra.mxu2 %v4455_v62 }
 0x102   :  { %v3606_v41 = vpop.f32.mrf.mxu3 }
 0x103   :  { %v446_v52 = vpop.f32.mrf.mxu0  ;;  %v492_v56 = vpop.f32.mrf.mxu1 }
 0x104   :  { %v493_v39 = vadd.f32 %v492_v56, %v443_v16  ;;  %v3609_v2 = vpop.f32.mrf.mxu2  ;;  %v447_v49 = vadd.f32 %v446_v52, %v395_v63  ;;  %v4461_v16 = vld [vmem:[#allocation14_spill] sm:$0xff]  ;;  %v605_v56 = vadd.f32 %v3518_v40, %v523_v32 }
 0x105   :  { %v4462_v52 = vld [vmem:[#allocation6_spill] sm:$0xff] }
 0x106   :  { %3088 = vst [vmem:[#allocation2 + $0x180] sm:$0xff] %v493_v39  ;;  %940 = vmatmul.f32.gmra.mxu0 %v4456_v27  ;;  %990 = vmatmul.f32.gmra.mxu1 %v4457_v31 }
 0x107   :  { %1119 = vmatmul.f32.gmra.mxu3 %v3350_v17  ;;  %v4463_v17 = vld [vmem:[#allocation22_spill] sm:$0xff] }
 0x108   :  { %1053 = vmatmul.f32.gmra.mxu2 %v4459_v34  ;;  %v531_v25 = vadd.f32 %v3538_v19, %v4463_v17  ;;  %v539_v19 = vadd.f32 %v3553_v22, %v3512_v1 }
 0x10a   :  { %v3616_v42 = vpop.f32.mrf.mxu3  ;;  %v609_v40 = vadd.f32 %v3533_v44, %v531_v25  ;;  %v613_v44 = vadd.f32 %v3548_v50, %v539_v19 }
 0x10b   :  { %v496_v45 = vpop.f32.mrf.mxu1  ;;  %v656_v12 = vpop.f32.mrf.mxu0 }
 0x10c   :  { %v497_v57 = vadd.f32 %v496_v45, %v447_v49  ;;  %v3620_v9 = vpop.f32.mrf.mxu2  ;;  %v657_v33 = vadd.f32 %v656_v12, %v605_v56 }
 0x10e   :  { %3096 = vst [vmem:[#allocation2 + $0x1c0] sm:$0xff] %v497_v57  ;;  %994 = vmatmul.f32.gmra.mxu1 %v4461_v16  ;;  %1143 = vmatmul.f32.vlgmr.msra.gmra.mxu0 %v3190_v5 }
 0x10f   :  { %1329 = vmatmul.f32.vlgmr.msra.gmra.mxu3 %v3190_v5 }
 0x110   :  { %1247 = vmatmul.f32.vlgmr.msra.gmra.mxu2 %v4462_v52 }
 0x112   :  { %v831_v39 = vpop.f32.mrf.mxu3 }
 0x113   :  { %v661_v18 = vpop.f32.mrf.mxu0  ;;  %v715_v63 = vpop.f32.mrf.mxu1 }
 0x114   :  { %v716_v49 = vadd.f32 %v715_v63, %v657_v33  ;;  %v781_v45 = vpop.f32.mrf.mxu2  ;;  %v662_v12 = vadd.f32 %v661_v18, %v609_v40 }
 0x116   :  { %v782_v57 = vadd.f32 %v781_v45, %v716_v49  ;;  %1147 = vmatmul.f32.gmra.mxu0 %v3192_v6  ;;  %1193 = vmatmul.f32.vlgmr.msra.gmra.mxu1 %v3190_v5 }
 0x117   :  { %1333 = vmatmul.f32.gmra.mxu3 %v3192_v6 }
 0x118   :  { %v832_v32 = vadd.f32 %v831_v39, %v782_v57  ;;  %1255 = vmatmul.f32.gmra.mxu2 %v3239_v36 }
 0x11a   :  { %3041 = vst [vmem:[#allocation2 + $0x8] sm:$0xff] %v832_v32  ;;  %v835_v56 = vpop.f32.mrf.mxu3 }
 0x11b   :  { %v666_v52 = vpop.f32.mrf.mxu0  ;;  %v721_v7 = vpop.f32.mrf.mxu1 }
 0x11c   :  { %v722_v33 = vadd.f32 %v721_v7, %v662_v12  ;;  %v785_v63 = vpop.f32.mrf.mxu2  ;;  %v667_v18 = vadd.f32 %v666_v52, %v613_v44  ;;  %v547_v7 = vadd.f32 %v3568_v15, %v3531_v8  ;;  %v555_v15 = vadd.f32 %v3583_v35, %v3542_v23 }
 0x11d   :  { %v563_v35 = vadd.f32 %v3598_v30, %v3561_v0 }
 0x11e   :  { %v786_v49 = vadd.f32 %v785_v63, %v722_v33  ;;  %1151 = vmatmul.f32.gmra.mxu0 %v3220_v21  ;;  %1197 = vmatmul.f32.gmra.mxu1 %v3192_v6  ;;  %v617_v50 = vadd.f32 %v3563_v59, %v547_v7  ;;  %v621_v59 = vadd.f32 %v3578_v3, %v555_v15 }
 0x11f   :  { %1337 = vmatmul.f32.gmra.mxu3 %v3220_v21  ;;  %v625_v3 = vadd.f32 %v3593_v26, %v563_v35 }
 0x120   :  { %v836_v39 = vadd.f32 %v835_v56, %v786_v49  ;;  %1263 = vmatmul.f32.gmra.mxu2 %v3262_v46 }
 0x122   :  { %3049 = vst [vmem:[#allocation2 + $0x48] sm:$0xff] %v836_v39  ;;  %v839_v25 = vpop.f32.mrf.mxu3 }
 0x123   :  { %v671_v45 = vpop.f32.mrf.mxu0  ;;  %v727_v57 = vpop.f32.mrf.mxu1 }
 0x124   :  { %v728_v22 = vadd.f32 %v727_v57, %v667_v18  ;;  %v789_v40 = vpop.f32.mrf.mxu2  ;;  %v672_v52 = vadd.f32 %v671_v45, %v617_v50 }
 0x126   :  { %v790_v32 = vadd.f32 %v789_v40, %v728_v22  ;;  %1155 = vmatmul.f32.gmra.mxu0 %v3244_v38  ;;  %1201 = vmatmul.f32.gmra.mxu1 %v3220_v21  ;;  %v25_v40 = vld [vmem:[%s4368_s1 + $0x10] sm:$0x77] }
 0x127   :  { %1341 = vmatmul.f32.gmra.mxu3 %v3244_v38  ;;  %83 = vst [vmem:[#allocation1 + $0x20] ss:$2 sm:$0xff] %v25_v40 }
 0x128   :  { %v840_v12 = vadd.f32 %v839_v25, %v790_v32  ;;  %1271 = vmatmul.f32.gmra.mxu2 %v3282_v53 }
 0x12a   :  { %3057 = vst [vmem:[#allocation2 + $0x88] sm:$0xff] %v840_v12  ;;  %v843_v56 = vpop.f32.mrf.mxu3 }
 0x12b   :  { %v676_v19 = vpop.f32.mrf.mxu0  ;;  %v733_v33 = vpop.f32.mrf.mxu1 }
 0x12c   :  { %v734_v63 = vadd.f32 %v733_v33, %v672_v52  ;;  %v793_v49 = vpop.f32.mrf.mxu2  ;;  %v677_v18 = vadd.f32 %v676_v19, %v621_v59  ;;  %v571_v19 = vadd.f32 %v3609_v2, %v3576_v14 }
 0x12e   :  { %v794_v44 = vadd.f32 %v793_v49, %v734_v63  ;;  %1159 = vmatmul.f32.gmra.mxu0 %v3267_v48  ;;  %1205 = vmatmul.f32.gmra.mxu1 %v3244_v38  ;;  %v90_v63 = vld.sshfl [vmem:[#allocation1 + $0x20] sm:$0xff pattern:$0x75316420]  ;;  %v629_v59 = vadd.f32 %v3606_v41, %v571_v19 }
 0x12f   :  { %1345 = vmatmul.f32.gmra.mxu3 %v3267_v48  ;;  %v128_v49 = vsel %vm119_vm1, %v90_v63, 0 }
 0x130   :  { %v844_v39 = vadd.f32 %v843_v56, %v794_v44  ;;  %1279 = vmatmul.f32.gmra.mxu2 %v3302_v60  ;;  %v1603_v26 = vand.u32 4294901760, %v128_v49 }
 0x132   :  { %3065 = vst [vmem:[#allocation2 + $0xc8] sm:$0xff] %v844_v39  ;;  %v847_v25 = vpop.f32.mrf.mxu3  ;;  %1604 = vmatpush.msra.mxu0 %v1603_v26  ;;  %1799 = vmatpush.msra.mxu3 %v1603_v26 }
 0x133   :  { %v681_v45 = vpop.f32.mrf.mxu0  ;;  %v739_v57 = vpop.f32.mrf.mxu1 }
 0x134   :  { %v740_v7 = vadd.f32 %v739_v57, %v677_v18  ;;  %v797_v22 = vpop.f32.mrf.mxu2  ;;  %v682_v30 = vadd.f32 %v681_v45, %v625_v3  ;;  %v1686_v18 = vsub.f32 %v128_v49, %v1603_v26 }
 0x136   :  { %v798_v32 = vadd.f32 %v797_v22, %v740_v7  ;;  %1163 = vmatmul.f32.gmra.mxu0 %v4453_v55  ;;  %1209 = vmatmul.f32.gmra.mxu1 %v3267_v48  ;;  %v1687_v45 = vand.u32 4294901760, %v1686_v18  ;;  %v579_v7 = vadd.f32 %v3620_v9, %v3591_v28 }
 0x137   :  { %1349 = vmatmul.f32.gmra.mxu3 %v4453_v55  ;;  %1741 = vmatpush.msra.mxu2 %v1686_v18 }
 0x138   :  { %v848_v50 = vadd.f32 %v847_v25, %v798_v32  ;;  %1287 = vmatmul.f32.gmra.mxu2 %v3325_v4  ;;  %v1688_v32 = vsub.f32 %v1686_v18, %v1687_v45 }
 0x13a   :  { %3073 = vst [vmem:[#allocation2 + $0x108] sm:$0xff] %v848_v50  ;;  %v851_v12 = vpop.f32.mrf.mxu3  ;;  %v1689_v3 = vand.u32 4294901760, %v1688_v32  ;;  %v633_v50 = vadd.f32 %v3616_v42, %v579_v7 }
 0x13b   :  { %v686_v52 = vpop.f32.mrf.mxu0  ;;  %v745_v56 = vpop.f32.mrf.mxu1 }
 0x13c   :  { %v746_v33 = vadd.f32 %v745_v56, %v682_v30  ;;  %v801_v15 = vpop.f32.mrf.mxu2  ;;  %v687_v2 = vadd.f32 %v686_v52, %v629_v59  ;;  %1690 = vmatpush.msra.mxu1 %v1689_v3 }
 0x13e   :  { %v802_v44 = vadd.f32 %v801_v15, %v746_v33  ;;  %1167 = vmatmul.f32.gmra.mxu0 %v4457_v31  ;;  %1213 = vmatmul.f32.gmra.mxu1 %v4453_v55 }
 0x13f   :  { %1353 = vmatmul.f32.gmra.mxu3 %v4457_v31 }
 0x140   :  { %v852_v39 = vadd.f32 %v851_v12, %v802_v44  ;;  %1295 = vmatmul.f32.gmra.mxu2 %v4452_v24 }
 0x142   :  { %3081 = vst [vmem:[#allocation2 + $0x148] sm:$0xff] %v852_v39  ;;  %v855_v25 = vpop.f32.mrf.mxu3  ;;  %v4464_v39 = vld [vmem:[#allocation5_spill] sm:$0xff] }
 0x143   :  { %v691_v57 = vpop.f32.mrf.mxu0  ;;  %v751_v35 = vpop.f32.mrf.mxu1 }
 0x144   :  { %v752_v22 = vadd.f32 %v751_v35, %v687_v2  ;;  %v805_v40 = vpop.f32.mrf.mxu2  ;;  %v692_v12 = vadd.f32 %v691_v57, %v633_v50 }
 0x146   :  { %v806_v41 = vadd.f32 %v805_v40, %v752_v22  ;;  %1171 = vmatmul.f32.gmra.mxu0 %v4461_v16  ;;  %1217 = vmatmul.f32.gmra.mxu1 %v4457_v31 }
 0x147   :  { %1357 = vmatmul.f32.gmra.mxu3 %v4461_v16 }
 0x148   :  { %v856_v30 = vadd.f32 %v855_v25, %v806_v41  ;;  %1303 = vmatmul.f32.gmra.mxu2 %v4456_v27 }
 0x14a   :  { %3089 = vst [vmem:[#allocation2 + $0x188] sm:$0xff] %v856_v30  ;;  %v859_v9 = vpop.f32.mrf.mxu3 }
 0x14b   :  { %v757_v52 = vpop.f32.mrf.mxu1  ;;  %v3680_v56 = vpop.f32.mrf.mxu0 }
 0x14c   :  { %v758_v19 = vadd.f32 %v757_v52, %v692_v12  ;;  %v809_v33 = vpop.f32.mrf.mxu2 }
 0x14e   :  { %v810_v15 = vadd.f32 %v809_v33, %v758_v19  ;;  %1221 = vmatmul.f32.gmra.mxu1 %v4461_v16  ;;  %1381 = vmatmul.f32.vlgmr.msrb.gmra.mxu0 %v3201_v10 }
 0x14f   :  { %1556 = vmatmul.f32.vlgmr.msrb.gmra.mxu3 %v3190_v5  ;;  %1867 = vmatpush.msrb.mxu0 %v1687_v45 }
 0x150   :  { %v860_v42 = vadd.f32 %v859_v9, %v810_v15  ;;  %1506 = vmatmul.f32.vlgmr.msrb.gmra.mxu2 %v3190_v5  ;;  %v91_v9 = vld.sshfl [vmem:[#allocation1 + $0x28] sm:$0xff pattern:$0x75316420] }
 0x151   :  { %v130_v52 = vsel %vm119_vm1, %v91_v9, 0 }
 0x152   :  { %3097 = vst [vmem:[#allocation2 + $0x1c8] sm:$0xff] %v860_v42  ;;  %v3686_v63 = vpop.f32.mrf.mxu3  ;;  %v1966_v19 = vand.u32 4294901760, %v130_v52 }
 0x153   :  { %v3688_v49 = vpop.f32.mrf.mxu0  ;;  %v3690_v44 = vpop.f32.mrf.mxu1 }
 0x154   :  { %v3692_v59 = vpop.f32.mrf.mxu2  ;;  %1967 = vmatpush.msrb.mxu2 %v1966_v19  ;;  %v2049_v15 = vsub.f32 %v130_v52, %v1966_v19 }
 0x156   :  { %1386 = vmatmul.f32.gmra.mxu0 %v3204_v11  ;;  %1440 = vmatmul.f32.vlgmr.msrb.gmra.mxu1 %v4464_v39  ;;  %v2050_v28 = vand.u32 4294901760, %v2049_v15 }
 0x157   :  { %1560 = vmatmul.f32.gmra.mxu3 %v3192_v6  ;;  %1917 = vmatpush.msrb.mxu1 %v1603_v26 }
 0x158   :  { %1510 = vmatmul.f32.gmra.mxu2 %v3192_v6 }
 0x15a   :  { %v3698_v18 = vpop.f32.mrf.mxu3 }
 0x15b   :  { %v3700_v2 = vpop.f32.mrf.mxu0  ;;  %v3702_v25 = vpop.f32.mrf.mxu1 }
 0x15c   :  { %v3704_v45 = vpop.f32.mrf.mxu2 }
 0x15e   :  { %1391 = vmatmul.f32.gmra.mxu0 %v3232_v29  ;;  %1446 = vmatmul.f32.gmra.mxu1 %v3218_v20 }
 0x15f   :  { %1564 = vmatmul.f32.gmra.mxu3 %v3220_v21 }
 0x160   :  { %1514 = vmatmul.f32.gmra.mxu2 %v3220_v21 }
 0x162   :  { %v3710_v57 = vpop.f32.mrf.mxu3 }
 0x163   :  { %v3712_v26 = vpop.f32.mrf.mxu0  ;;  %v3714_v35 = vpop.f32.mrf.mxu1 }
 0x164   :  { %v3716_v7 = vpop.f32.mrf.mxu2 }
 0x166   :  { %1396 = vmatmul.f32.gmra.mxu0 %v3254_v43  ;;  %1452 = vmatmul.f32.gmra.mxu1 %v3242_v37 }
 0x167   :  { %1568 = vmatmul.f32.gmra.mxu3 %v3244_v38 }
 0x168   :  { %1518 = vmatmul.f32.gmra.mxu2 %v3244_v38 }
 0x16a   :  { %v3722_v22 = vpop.f32.mrf.mxu3 }
 0x16b   :  { %v3724_v40 = vpop.f32.mrf.mxu0  ;;  %v3726_v32 = vpop.f32.mrf.mxu1 }
 0x16c   :  { %v3728_v41 = vpop.f32.mrf.mxu2 }
 0x16e   :  { %1401 = vmatmul.f32.gmra.mxu0 %v3277_v51  ;;  %1458 = vmatmul.f32.gmra.mxu1 %v3265_v47 }
 0x16f   :  { %1572 = vmatmul.f32.gmra.mxu3 %v3267_v48 }
 0x170   :  { %1522 = vmatmul.f32.gmra.mxu2 %v3267_v48  ;;  %v886_v48 = vadd.f32 %v3680_v56, %v4460_v13  ;;  %v894_v56 = vadd.f32 %v3688_v49, %v4463_v17 }
 0x172   :  { %v3734_v3 = vpop.f32.mrf.mxu3 }
 0x173   :  { %v3736_v50 = vpop.f32.mrf.mxu0  ;;  %v3738_v30 = vpop.f32.mrf.mxu1 }
 0x174   :  { %v3740_v12 = vpop.f32.mrf.mxu2 }
 0x176   :  { %1406 = vmatmul.f32.gmra.mxu0 %v3297_v58  ;;  %1464 = vmatmul.f32.gmra.mxu1 %v3285_v54  ;;  %v2051_v58 = vsub.f32 %v2049_v15, %v2050_v28 }
 0x177   :  { %1576 = vmatmul.f32.gmra.mxu3 %v4453_v55 }
 0x178   :  { %1526 = vmatmul.f32.gmra.mxu2 %v4453_v55  ;;  %v2052_v9 = vand.u32 4294901760, %v2051_v58  ;;  %v968_v58 = vadd.f32 %v3690_v44, %v886_v48  ;;  %v972_v44 = vadd.f32 %v3702_v25, %v894_v56 }
 0x17a   :  { %v3747_v33 = vpop.f32.mrf.mxu3  ;;  %2053 = vmatpush.msrb.mxu3 %v2052_v9  ;;  %v1020_v13 = vadd.f32 %v3692_v59, %v968_v58 }
 0x17b   :  { %4465 = vst [vmem:[#allocation21_spill] sm:$0xff] %v3747_v33  ;;  %v3749_v42 = vpop.f32.mrf.mxu0  ;;  %v3751_v27 = vpop.f32.mrf.mxu1 }
 0x17c   :  { %v3753_v24 = vpop.f32.mrf.mxu2  ;;  %v1079_v48 = vadd.f32 %v3686_v63, %v1020_v13 }
 0x17e   :  { %1411 = vmatmul.f32.gmra.mxu0 %v4455_v62  ;;  %1470 = vmatmul.f32.gmra.mxu1 %v3305_v61  ;;  %v4468_v62 = vld [vmem:[#allocation13_spill] sm:$0xff] }
 0x17f   :  { %1580 = vmatmul.f32.gmra.mxu3 %v4457_v31 }
 0x180   :  { %1530 = vmatmul.f32.gmra.mxu2 %v4457_v31 }
 0x182   :  { %v3759_v55 = vpop.f32.mrf.mxu3 }
 0x183   :  { %4466 = vst [vmem:[#allocation20_spill] sm:$0xff] %v3759_v55  ;;  %v3761_v52 = vpop.f32.mrf.mxu0  ;;  %v3763_v33 = vpop.f32.mrf.mxu1 }
 0x184   :  { %v3767_v4 = vpop.f32.mrf.mxu2 }
 0x185   :  { %4467 = vst [vmem:[#allocation23_spill] sm:$0xff] %v3767_v4 }
 0x186   :  { %1416 = vmatmul.f32.gmra.mxu0 %v4459_v34  ;;  %1476 = vmatmul.f32.gmra.mxu1 %v4468_v62  ;;  %v4469_v34 = vld [vmem:[#allocation17_spill] sm:$0xff]  ;;  %v4470_v62 = vld [vmem:[#allocation6_spill] sm:$0xff] }
 0x187   :  { %1584 = vmatmul.f32.gmra.mxu3 %v4461_v16 }
 0x188   :  { %1534 = vmatmul.f32.gmra.mxu2 %v4461_v16  ;;  %v902_v16 = vadd.f32 %v3700_v2, %v3512_v1 }
 0x18a   :  { %v3774_v9 = vpop.f32.mrf.mxu3 }
 0x18b   :  { %v3776_v31 = vpop.f32.mrf.mxu1  ;;  %v1144_v55 = vpop.f32.mrf.mxu0 }
 0x18c   :  { %v3781_v4 = vpop.f32.mrf.mxu2  ;;  %v1145_v49 = vadd.f32 %v1144_v55, %v1079_v48  ;;  %v976_v55 = vadd.f32 %v3714_v35, %v902_v16 }
 0x18e   :  { %1482 = vmatmul.f32.gmra.mxu1 %v4469_v34  ;;  %1610 = vmatmul.f32.vlgmr.msra.gmra.mxu0 %v4470_v62  ;;  %v1025_v62 = vadd.f32 %v3704_v45, %v972_v44  ;;  %v1030_v45 = vadd.f32 %v3716_v7, %v976_v55  ;;  %v926_v55 = vadd.f32 %v3736_v50, %v3561_v0 }
 0x18f   :  { %1803 = vmatmul.f32.vlgmr.msra.gmra.mxu3 %v4464_v39  ;;  %2104 = vmatpush.msra.mxu0 %v2049_v15 }
 0x190   :  { %1744 = vmatmul.f32.vlgmr.msra.gmra.mxu2 %v3201_v10  ;;  %2280 = vmatpush.msra.mxu3 %v1966_v19 }
 0x191   :  { %2230 = vmatpush.msra.mxu2 %v2050_v28  ;;  %v1085_v28 = vadd.f32 %v3698_v18, %v1025_v62  ;;  %v1091_v62 = vadd.f32 %v3710_v57, %v1030_v45 }
 0x192   :  { %v3789_v17 = vpop.f32.mrf.mxu3 }
 0x193   :  { %v1148_v59 = vpop.f32.mrf.mxu0  ;;  %v1194_v58 = vpop.f32.mrf.mxu1 }
 0x194   :  { %v1195_v39 = vadd.f32 %v1194_v58, %v1145_v49  ;;  %v3794_v15 = vpop.f32.mrf.mxu2  ;;  %v1149_v13 = vadd.f32 %v1148_v59, %v1085_v28 }
 0x196   :  { %3042 = vst [vmem:[#allocation2 + $0x10] sm:$0xff] %v1195_v39  ;;  %1618 = vmatmul.f32.gmra.mxu0 %v3239_v36  ;;  %1692 = vmatmul.f32.vlgmr.msra.gmra.mxu1 %v3190_v5  ;;  %v910_v39 = vadd.f32 %v3712_v26, %v3531_v8 }
 0x197   :  { %1809 = vmatmul.f32.gmra.mxu3 %v3218_v20  ;;  %2162 = vmatpush.msra.mxu1 %v1966_v19  ;;  %v918_v19 = vadd.f32 %v3724_v40, %v3542_v23 }
 0x198   :  { %1749 = vmatmul.f32.gmra.mxu2 %v3204_v11  ;;  %v980_v16 = vadd.f32 %v3726_v32, %v910_v39 }
 0x199   :  { %v984_v32 = vadd.f32 %v3738_v30, %v918_v19  ;;  %v988_v30 = vadd.f32 %v3751_v27, %v926_v55  ;;  %v4473_v27 = vld [vmem:[#allocation21_spill] sm:$0xff] }
 0x19a   :  { %v3802_v63 = vpop.f32.mrf.mxu3  ;;  %v1035_v44 = vadd.f32 %v3728_v41, %v980_v16 }
 0x19b   :  { %v1152_v2 = vpop.f32.mrf.mxu0  ;;  %v1198_v25 = vpop.f32.mrf.mxu1 }
 0x19c   :  { %v1199_v56 = vadd.f32 %v1198_v25, %v1149_v13  ;;  %v3807_v48 = vpop.f32.mrf.mxu2  ;;  %v1153_v18 = vadd.f32 %v1152_v2, %v1091_v62  ;;  %v1097_v57 = vadd.f32 %v3722_v22, %v1035_v44  ;;  %v1040_v13 = vadd.f32 %v3740_v12, %v984_v32  ;;  %v4474_v44 = vld [vmem:[#allocation9_spill] sm:$0xff]  ;;  %v4475_v32 = vld [vmem:[#allocation24_spill] sm:$0xff] }
 0x19d   :  { %v1045_v62 = vadd.f32 %v3753_v24, %v988_v30  ;;  %v4480_v30 = vld [vmem:[#allocation20_spill] sm:$0xff] }
 0x19e   :  { %3050 = vst [vmem:[#allocation2 + $0x50] sm:$0xff] %v1199_v56  ;;  %1626 = vmatmul.f32.gmra.mxu0 %v3262_v46  ;;  %1696 = vmatmul.f32.gmra.mxu1 %v3192_v6  ;;  %v1103_v22 = vadd.f32 %v3734_v3, %v1040_v13  ;;  %v934_v56 = vadd.f32 %v3749_v42, %v3576_v14  ;;  %v4472_v3 = vld [vmem:[#allocation7_spill] sm:$0xff] }
 0x19f   :  { %1815 = vmatmul.f32.gmra.mxu3 %v3242_v37 }
 0x1a0   :  { %1754 = vmatmul.f32.gmra.mxu2 %v3232_v29  ;;  %v992_v19 = vadd.f32 %v3763_v33, %v934_v56  ;;  %v4479_v33 = vld [vmem:[#allocation13_spill] sm:$0xff] }
 0x1a2   :  { %v3815_v26 = vpop.f32.mrf.mxu3 }
 0x1a3   :  { %v1156_v35 = vpop.f32.mrf.mxu0  ;;  %v1202_v7 = vpop.f32.mrf.mxu1 }
 0x1a4   :  { %v1203_v49 = vadd.f32 %v1202_v7, %v1153_v18  ;;  %v3820_v59 = vpop.f32.mrf.mxu2  ;;  %v1157_v58 = vadd.f32 %v1156_v35, %v1097_v57  ;;  %v4471_v35 = vld [vmem:[#allocation12_spill] sm:$0xff]  ;;  %v1109_v7 = vadd.f32 %v4473_v27, %v1045_v62 }
 0x1a6   :  { %3058 = vst [vmem:[#allocation2 + $0x90] sm:$0xff] %v1203_v49  ;;  %1634 = vmatmul.f32.gmra.mxu0 %v3282_v53  ;;  %1700 = vmatmul.f32.gmra.mxu1 %v3220_v21 }
 0x1a7   :  { %1821 = vmatmul.f32.gmra.mxu3 %v3265_v47 }
 0x1a8   :  { %1759 = vmatmul.f32.gmra.mxu2 %v3254_v43 }
 0x1aa   :  { %v3828_v40 = vpop.f32.mrf.mxu3 }
 0x1ab   :  { %v1160_v41 = vpop.f32.mrf.mxu0  ;;  %v1206_v28 = vpop.f32.mrf.mxu1 }
 0x1ac   :  { %v1207_v2 = vadd.f32 %v1206_v28, %v1157_v58  ;;  %v3833_v25 = vpop.f32.mrf.mxu2  ;;  %v1161_v39 = vadd.f32 %v1160_v41, %v1103_v22  ;;  %v942_v58 = vadd.f32 %v3761_v52, %v4475_v32  ;;  %v4476_v41 = vld [vmem:[#allocation23_spill] sm:$0xff]  ;;  %v4478_v22 = vld [vmem:[#allocation8_spill] sm:$0xff] }
 0x1ad   :  { %v1050_v28 = vadd.f32 %v4476_v41, %v992_v19 }
 0x1ae   :  { %3066 = vst [vmem:[#allocation2 + $0xd0] sm:$0xff] %v1207_v2  ;;  %1642 = vmatmul.f32.gmra.mxu0 %v3302_v60  ;;  %1704 = vmatmul.f32.gmra.mxu1 %v3244_v38  ;;  %v4477_v2 = vld [vmem:[#allocation16_spill] sm:$0xff] }
 0x1af   :  { %1827 = vmatmul.f32.gmra.mxu3 %v3285_v54 }
 0x1b0   :  { %1764 = vmatmul.f32.gmra.mxu2 %v3277_v51 }
 0x1b2   :  { %v3841_v50 = vpop.f32.mrf.mxu3 }
 0x1b3   :  { %v1164_v12 = vpop.f32.mrf.mxu0  ;;  %v1210_v45 = vpop.f32.mrf.mxu1 }
 0x1b4   :  { %v1211_v16 = vadd.f32 %v1210_v45, %v1161_v39  ;;  %v3846_v18 = vpop.f32.mrf.mxu2  ;;  %v1165_v49 = vadd.f32 %v1164_v12, %v1109_v7  ;;  %v1115_v39 = vadd.f32 %v4480_v30, %v1050_v28  ;;  %v996_v12 = vadd.f32 %v3776_v31, %v942_v58  ;;  %v4481_v45 = vld [vmem:[#allocation11_spill] sm:$0xff] }
 0x1b5   :  { %v4484_v58 = vld [vmem:[#allocation15_spill] sm:$0xff] }
 0x1b6   :  { %3074 = vst [vmem:[#allocation2 + $0x110] sm:$0xff] %v1211_v16  ;;  %1650 = vmatmul.f32.gmra.mxu0 %v4471_v35  ;;  %1708 = vmatmul.f32.gmra.mxu1 %v4472_v3  ;;  %v1055_v27 = vadd.f32 %v3781_v4, %v996_v12  ;;  %v4485_v4 = vld [vmem:[#allocation19_spill] sm:$0xff] }
 0x1b7   :  { %1833 = vmatmul.f32.gmra.mxu3 %v3305_v61  ;;  %v1249_v30 = vadd.f32 %v3794_v15, %v4485_v4 }
 0x1b8   :  { %1769 = vmatmul.f32.gmra.mxu2 %v4474_v44  ;;  %v1121_v31 = vadd.f32 %v3774_v9, %v1055_v27 }
 0x1b9   :  { %v1331_v9 = vadd.f32 %v3789_v17, %v1249_v30 }
 0x1ba   :  { %v3854_v42 = vpop.f32.mrf.mxu3 }
 0x1bb   :  { %v1168_v24 = vpop.f32.mrf.mxu0  ;;  %v1214_v57 = vpop.f32.mrf.mxu1 }
 0x1bc   :  { %v1215_v55 = vadd.f32 %v1214_v57, %v1165_v49  ;;  %v3859_v13 = vpop.f32.mrf.mxu2  ;;  %v1169_v56 = vadd.f32 %v1168_v24, %v1115_v39  ;;  %v4482_v49 = vld [vmem:[#allocation18_spill] sm:$0xff] }
 0x1bd   :  { %v4483_v57 = vld [vmem:[#allocation10_spill] sm:$0xff] }
 0x1be   :  { %3082 = vst [vmem:[#allocation2 + $0x150] sm:$0xff] %v1215_v55  ;;  %1658 = vmatmul.f32.gmra.mxu0 %v4477_v2  ;;  %1712 = vmatmul.f32.gmra.mxu1 %v4478_v22 }
 0x1bf   :  { %1839 = vmatmul.f32.gmra.mxu3 %v4479_v33 }
 0x1c0   :  { %1774 = vmatmul.f32.gmra.mxu2 %v4481_v45 }
 0x1c2   :  { %v3867_v52 = vpop.f32.mrf.mxu3 }
 0x1c3   :  { %v1172_v62 = vpop.f32.mrf.mxu0  ;;  %v1218_v16 = vpop.f32.mrf.mxu1 }
 0x1c4   :  { %v1219_v7 = vadd.f32 %v1218_v16, %v1169_v56  ;;  %v3870_v19 = vpop.f32.mrf.mxu2  ;;  %v1173_v24 = vadd.f32 %v1172_v62, %v1121_v31  ;;  %v4486_v56 = vld [vmem:[#allocation14_spill] sm:$0xff] }
 0x1c5   :  { %v4487_v62 = vld [vmem:[#allocation6_spill] sm:$0xff] }
 0x1c6   :  { %3090 = vst [vmem:[#allocation2 + $0x190] sm:$0xff] %v1219_v7  ;;  %1666 = vmatmul.f32.gmra.mxu0 %v4482_v49  ;;  %1716 = vmatmul.f32.gmra.mxu1 %v4483_v57 }
 0x1c7   :  { %1845 = vmatmul.f32.gmra.mxu3 %v4469_v34  ;;  %v4488_v34 = vld [vmem:[#allocation22_spill] sm:$0xff] }
 0x1c8   :  { %1779 = vmatmul.f32.gmra.mxu2 %v4484_v58  ;;  %v1257_v15 = vadd.f32 %v3807_v48, %v4488_v34  ;;  %v1265_v48 = vadd.f32 %v3820_v59, %v3512_v1  ;;  %v1273_v59 = vadd.f32 %v3833_v25, %v3531_v8  ;;  %v1281_v25 = vadd.f32 %v3846_v18, %v3542_v23 }
 0x1c9   :  { %v1289_v18 = vadd.f32 %v3859_v13, %v3561_v0 }
 0x1ca   :  { %v3877_v41 = vpop.f32.mrf.mxu3  ;;  %v1335_v17 = vadd.f32 %v3802_v63, %v1257_v15  ;;  %v1339_v63 = vadd.f32 %v3815_v26, %v1265_v48  ;;  %v1343_v26 = vadd.f32 %v3828_v40, %v1273_v59  ;;  %v1347_v40 = vadd.f32 %v3841_v50, %v1281_v25 }
 0x1cb   :  { %v1222_v28 = vpop.f32.mrf.mxu1  ;;  %v1382_v55 = vpop.f32.mrf.mxu0  ;;  %v1351_v50 = vadd.f32 %v3854_v42, %v1289_v18 }
 0x1cc   :  { %v1223_v39 = vadd.f32 %v1222_v28, %v1173_v24  ;;  %v3881_v12 = vpop.f32.mrf.mxu2  ;;  %v1383_v16 = vadd.f32 %v1382_v55, %v1331_v9 }
 0x1ce   :  { %3098 = vst [vmem:[#allocation2 + $0x1d0] sm:$0xff] %v1223_v39  ;;  %1720 = vmatmul.f32.gmra.mxu1 %v4486_v56  ;;  %1869 = vmatmul.f32.vlgmr.msrb.gmra.mxu0 %v3190_v5 }
 0x1cf   :  { %2055 = vmatmul.f32.vlgmr.msrb.gmra.mxu3 %v3190_v5 }
 0x1d0   :  { %1973 = vmatmul.f32.vlgmr.msrb.gmra.mxu2 %v4487_v62 }
 0x1d2   :  { %v1557_v27 = vpop.f32.mrf.mxu3 }
 0x1d3   :  { %v1387_v7 = vpop.f32.mrf.mxu0  ;;  %v1441_v31 = vpop.f32.mrf.mxu1 }
 0x1d4   :  { %v1442_v24 = vadd.f32 %v1441_v31, %v1383_v16  ;;  %v1507_v28 = vpop.f32.mrf.mxu2  ;;  %v1388_v55 = vadd.f32 %v1387_v7, %v1335_v17 }
 0x1d6   :  { %v1508_v39 = vadd.f32 %v1507_v28, %v1442_v24  ;;  %1873 = vmatmul.f32.gmra.mxu0 %v3192_v6  ;;  %1919 = vmatmul.f32.vlgmr.msrb.gmra.mxu1 %v3190_v5 }
 0x1d7   :  { %2059 = vmatmul.f32.gmra.mxu3 %v3192_v6 }
 0x1d8   :  { %v1558_v30 = vadd.f32 %v1557_v27, %v1508_v39  ;;  %1981 = vmatmul.f32.gmra.mxu2 %v3239_v36 }
 0x1da   :  { %3043 = vst [vmem:[#allocation2 + $0x18] sm:$0xff] %v1558_v30  ;;  %v1561_v9 = vpop.f32.mrf.mxu3 }
 0x1db   :  { %v1392_v62 = vpop.f32.mrf.mxu0  ;;  %v1447_v33 = vpop.f32.mrf.mxu1 }
 0x1dc   :  { %v1448_v16 = vadd.f32 %v1447_v33, %v1388_v55  ;;  %v1511_v31 = vpop.f32.mrf.mxu2  ;;  %v1393_v7 = vadd.f32 %v1392_v62, %v1339_v63 }
 0x1de   :  { %v1512_v24 = vadd.f32 %v1511_v31, %v1448_v16  ;;  %1877 = vmatmul.f32.gmra.mxu0 %v3220_v21  ;;  %1923 = vmatmul.f32.gmra.mxu1 %v3192_v6 }
 0x1df   :  { %2063 = vmatmul.f32.gmra.mxu3 %v3220_v21 }
 0x1e0   :  { %v1562_v27 = vadd.f32 %v1561_v9, %v1512_v24  ;;  %1989 = vmatmul.f32.gmra.mxu2 %v3262_v46 }
 0x1e2   :  { %3051 = vst [vmem:[#allocation2 + $0x58] sm:$0xff] %v1562_v27  ;;  %v1565_v15 = vpop.f32.mrf.mxu3 }
 0x1e3   :  { %v1397_v28 = vpop.f32.mrf.mxu0  ;;  %v1453_v39 = vpop.f32.mrf.mxu1 }
 0x1e4   :  { %v1454_v33 = vadd.f32 %v1453_v39, %v1393_v7  ;;  %v1515_v17 = vpop.f32.mrf.mxu2  ;;  %v1398_v62 = vadd.f32 %v1397_v28, %v1343_v26 }
 0x1e6   :  { %v1516_v30 = vadd.f32 %v1515_v17, %v1454_v33  ;;  %1881 = vmatmul.f32.gmra.mxu0 %v3244_v38  ;;  %1927 = vmatmul.f32.gmra.mxu1 %v3220_v21  ;;  %v26_v17 = vld [vmem:[%s4368_s1 + $0x18] sm:$0x77]  ;;  %s3156_s1 = smov [#allocation2]  }
 0x1e7   :  { %2067 = vmatmul.f32.gmra.mxu3 %v3244_v38  ;;  %85 = vst [vmem:[#allocation1 + $0x30] ss:$2 sm:$0xff] %v26_v17  ;;  %s3108_s23 = sshll.u32 %s3156_s1, 4  ;;  %s3109_s23 = int_to_ptr.vmem [resolvable:$true] %s3108_s23 }
 0x1e8   :  { %v1566_v55 = vadd.f32 %v1565_v15, %v1516_v30  ;;  %1997 = vmatmul.f32.gmra.mxu2 %v3282_v53 }
 0x1ea   :  { %3059 = vst [vmem:[#allocation2 + $0x98] sm:$0xff] %v1566_v55  ;;  %v1569_v9 = vpop.f32.mrf.mxu3 }
 0x1eb   :  { %v1402_v48 = vpop.f32.mrf.mxu0  ;;  %v1459_v16 = vpop.f32.mrf.mxu1 }
 0x1ec   :  { %v1460_v31 = vadd.f32 %v1459_v16, %v1398_v62  ;;  %v1519_v24 = vpop.f32.mrf.mxu2  ;;  %v1403_v7 = vadd.f32 %v1402_v48, %v1347_v40  ;;  %v1297_v48 = vadd.f32 %v3870_v19, %v3576_v14 }
 0x1ee   :  { %v1520_v63 = vadd.f32 %v1519_v24, %v1460_v31  ;;  %1885 = vmatmul.f32.gmra.mxu0 %v4472_v3  ;;  %1931 = vmatmul.f32.gmra.mxu1 %v3244_v38  ;;  %v92_v31 = vld.sshfl [vmem:[#allocation1 + $0x30] sm:$0xff pattern:$0x75316420]  ;;  %v1355_v40 = vadd.f32 %v3867_v52, %v1297_v48 }
 0x1ef   :  { %2071 = vmatmul.f32.gmra.mxu3 %v4472_v3  ;;  %v132_v24 = vsel %vm119_vm1, %v92_v31, 0 }
 0x1f0   :  { %v1570_v27 = vadd.f32 %v1569_v9, %v1520_v63  ;;  %2005 = vmatmul.f32.gmra.mxu2 %v3302_v60  ;;  %v2329_v42 = vand.u32 4294901760, %v132_v24 }
 0x1f2   :  { %3067 = vst [vmem:[#allocation2 + $0xd8] sm:$0xff] %v1570_v27  ;;  %v1573_v15 = vpop.f32.mrf.mxu3  ;;  %2330 = vmatpush.msrb.mxu0 %v2329_v42  ;;  %2525 = vmatpush.msrb.mxu3 %v2329_v42 }
 0x1f3   :  { %v1407_v28 = vpop.f32.mrf.mxu0  ;;  %v1465_v39 = vpop.f32.mrf.mxu1 }
 0x1f4   :  { %v1466_v59 = vadd.f32 %v1465_v39, %v1403_v7  ;;  %v1523_v33 = vpop.f32.mrf.mxu2  ;;  %v1408_v13 = vadd.f32 %v1407_v28, %v1351_v50  ;;  %v2412_v7 = vsub.f32 %v132_v24, %v2329_v42 }
 0x1f6   :  { %v1524_v30 = vadd.f32 %v1523_v33, %v1466_v59  ;;  %1889 = vmatmul.f32.gmra.mxu0 %v4478_v22  ;;  %1935 = vmatmul.f32.gmra.mxu1 %v4472_v3  ;;  %v2413_v28 = vand.u32 4294901760, %v2412_v7  ;;  %v1305_v59 = vadd.f32 %v3881_v12, %v4475_v32 }
 0x1f7   :  { %2075 = vmatmul.f32.gmra.mxu3 %v4478_v22  ;;  %2467 = vmatpush.msrb.mxu2 %v2412_v7 }
 0x1f8   :  { %v1574_v26 = vadd.f32 %v1573_v15, %v1524_v30  ;;  %2013 = vmatmul.f32.gmra.mxu2 %v4471_v35  ;;  %v2414_v30 = vsub.f32 %v2412_v7, %v2413_v28 }
 0x1fa   :  { %3075 = vst [vmem:[#allocation2 + $0x118] sm:$0xff] %v1574_v26  ;;  %v1577_v55 = vpop.f32.mrf.mxu3  ;;  %v2415_v50 = vand.u32 4294901760, %v2414_v30  ;;  %v1359_v26 = vadd.f32 %v3877_v41, %v1305_v59 }
 0x1fb   :  { %v1412_v62 = vpop.f32.mrf.mxu0  ;;  %v1471_v9 = vpop.f32.mrf.mxu1 }
 0x1fc   :  { %v1472_v16 = vadd.f32 %v1471_v9, %v1408_v13  ;;  %v1527_v25 = vpop.f32.mrf.mxu2  ;;  %v1413_v19 = vadd.f32 %v1412_v62, %v1355_v40  ;;  %2416 = vmatpush.msrb.mxu1 %v2415_v50 }
 0x1fe   :  { %v1528_v63 = vadd.f32 %v1527_v25, %v1472_v16  ;;  %1893 = vmatmul.f32.gmra.mxu0 %v4483_v57  ;;  %1939 = vmatmul.f32.gmra.mxu1 %v4478_v22 }
 0x1ff   :  { %2079 = vmatmul.f32.gmra.mxu3 %v4483_v57 }
 0x200   :  { %v1578_v27 = vadd.f32 %v1577_v55, %v1528_v63  ;;  %2021 = vmatmul.f32.gmra.mxu2 %v4477_v2 }
 0x202   :  { %3083 = vst [vmem:[#allocation2 + $0x158] sm:$0xff] %v1578_v27  ;;  %v1581_v15 = vpop.f32.mrf.mxu3  ;;  %v4489_v27 = vld [vmem:[#allocation5_spill] sm:$0xff] }
 0x203   :  { %v1417_v39 = vpop.f32.mrf.mxu0  ;;  %v1477_v18 = vpop.f32.mrf.mxu1 }
 0x204   :  { %v1478_v33 = vadd.f32 %v1477_v18, %v1413_v19  ;;  %v1531_v17 = vpop.f32.mrf.mxu2  ;;  %v1418_v55 = vadd.f32 %v1417_v39, %v1359_v26 }
 0x206   :  { %v1532_v52 = vadd.f32 %v1531_v17, %v1478_v33  ;;  %1897 = vmatmul.f32.gmra.mxu0 %v4486_v56  ;;  %1943 = vmatmul.f32.gmra.mxu1 %v4483_v57 }
 0x207   :  { %2083 = vmatmul.f32.gmra.mxu3 %v4486_v56 }
 0x208   :  { %v1582_v13 = vadd.f32 %v1581_v15, %v1532_v52  ;;  %2029 = vmatmul.f32.gmra.mxu2 %v4482_v49 }
 0x20a   :  { %3091 = vst [vmem:[#allocation2 + $0x198] sm:$0xff] %v1582_v13  ;;  %v1585_v12 = vpop.f32.mrf.mxu3 }
 0x20b   :  { %v1483_v62 = vpop.f32.mrf.mxu1  ;;  %v3941_v9 = vpop.f32.mrf.mxu0 }
 0x20c   :  { %v1484_v48 = vadd.f32 %v1483_v62, %v1418_v55  ;;  %v1535_v16 = vpop.f32.mrf.mxu2 }
 0x20e   :  { %v1536_v25 = vadd.f32 %v1535_v16, %v1484_v48  ;;  %1947 = vmatmul.f32.gmra.mxu1 %v4486_v56  ;;  %2107 = vmatmul.f32.vlgmr.msra.gmra.mxu0 %v3201_v10 }
 0x20f   :  { %2282 = vmatmul.f32.vlgmr.msra.gmra.mxu3 %v3190_v5  ;;  %2593 = vmatpush.msra.mxu0 %v2413_v28 }
 0x210   :  { %v1586_v41 = vadd.f32 %v1585_v12, %v1536_v25  ;;  %2232 = vmatmul.f32.vlgmr.msra.gmra.mxu2 %v3190_v5  ;;  %v93_v12 = vld.sshfl [vmem:[#allocation1 + $0x38] sm:$0xff pattern:$0x75316420] }
 0x211   :  { %v134_v62 = vsel %vm119_vm1, %v93_v12, 0 }
 0x212   :  { %3099 = vst [vmem:[#allocation2 + $0x1d8] sm:$0xff] %v1586_v41  ;;  %v3947_v31 = vpop.f32.mrf.mxu3  ;;  %v2692_v48 = vand.u32 4294901760, %v134_v62 }
 0x213   :  { %v3949_v24 = vpop.f32.mrf.mxu0  ;;  %v3951_v63 = vpop.f32.mrf.mxu1 }
 0x214   :  { %v3953_v40 = vpop.f32.mrf.mxu2  ;;  %2693 = vmatpush.msra.mxu2 %v2692_v48  ;;  %v2775_v25 = vsub.f32 %v134_v62, %v2692_v48 }
 0x216   :  { %2112 = vmatmul.f32.gmra.mxu0 %v3204_v11  ;;  %2166 = vmatmul.f32.vlgmr.msra.gmra.mxu1 %v4489_v27  ;;  %v2776_v32 = vand.u32 4294901760, %v2775_v25 }
 0x217   :  { %2286 = vmatmul.f32.gmra.mxu3 %v3192_v6  ;;  %2643 = vmatpush.msra.mxu1 %v2329_v42 }
 0x218   :  { %2236 = vmatmul.f32.gmra.mxu2 %v3192_v6 }
 0x21a   :  { %v3959_v7 = vpop.f32.mrf.mxu3 }
 0x21b   :  { %v3961_v19 = vpop.f32.mrf.mxu0  ;;  %v3963_v15 = vpop.f32.mrf.mxu1 }
 0x21c   :  { %v3965_v28 = vpop.f32.mrf.mxu2 }
 0x21e   :  { %2117 = vmatmul.f32.gmra.mxu0 %v3232_v29  ;;  %2172 = vmatmul.f32.gmra.mxu1 %v3218_v20 }
 0x21f   :  { %2290 = vmatmul.f32.gmra.mxu3 %v3220_v21 }
 0x220   :  { %2240 = vmatmul.f32.gmra.mxu2 %v3220_v21 }
 0x222   :  { %v3971_v39 = vpop.f32.mrf.mxu3 }
 0x223   :  { %v3973_v42 = vpop.f32.mrf.mxu0  ;;  %v3975_v18 = vpop.f32.mrf.mxu1 }
 0x224   :  { %v3977_v59 = vpop.f32.mrf.mxu2 }
 0x226   :  { %2122 = vmatmul.f32.gmra.mxu0 %v3254_v43  ;;  %2178 = vmatmul.f32.gmra.mxu1 %v3242_v37 }
 0x227   :  { %2294 = vmatmul.f32.gmra.mxu3 %v3244_v38 }
 0x228   :  { %2244 = vmatmul.f32.gmra.mxu2 %v3244_v38 }
 0x22a   :  { %v3983_v33 = vpop.f32.mrf.mxu3 }
 0x22b   :  { %v3985_v17 = vpop.f32.mrf.mxu0  ;;  %v3987_v30 = vpop.f32.mrf.mxu1 }
 0x22c   :  { %v3989_v52 = vpop.f32.mrf.mxu2 }
 0x22e   :  { %2127 = vmatmul.f32.gmra.mxu0 %v3277_v51  ;;  %2184 = vmatmul.f32.gmra.mxu1 %v3265_v47 }
 0x22f   :  { %2298 = vmatmul.f32.gmra.mxu3 %v4472_v3 }
 0x230   :  { %2248 = vmatmul.f32.gmra.mxu2 %v4472_v3  ;;  %v1612_v3 = vadd.f32 %v3941_v9, %v4485_v4  ;;  %v1620_v9 = vadd.f32 %v3949_v24, %v4488_v34 }
 0x232   :  { %v3995_v50 = vpop.f32.mrf.mxu3 }
 0x233   :  { %v3997_v26 = vpop.f32.mrf.mxu0  ;;  %v3999_v13 = vpop.f32.mrf.mxu1 }
 0x234   :  { %v4001_v55 = vpop.f32.mrf.mxu2 }
 0x236   :  { %2132 = vmatmul.f32.gmra.mxu0 %v4474_v44  ;;  %2190 = vmatmul.f32.gmra.mxu1 %v3285_v54  ;;  %v2777_v44 = vsub.f32 %v2775_v25, %v2776_v32 }
 0x237   :  { %2302 = vmatmul.f32.gmra.mxu3 %v4478_v22 }
 0x238   :  { %2252 = vmatmul.f32.gmra.mxu2 %v4478_v22  ;;  %v2778_v12 = vand.u32 4294901760, %v2777_v44  ;;  %v1694_v44 = vadd.f32 %v3951_v63, %v1612_v3  ;;  %v1698_v63 = vadd.f32 %v3963_v15, %v1620_v9 }
 0x23a   :  { %v4008_v16 = vpop.f32.mrf.mxu3  ;;  %2779 = vmatpush.msra.mxu3 %v2778_v12  ;;  %v1746_v4 = vadd.f32 %v3953_v40, %v1694_v44 }
 0x23b   :  { %4490 = vst [vmem:[#allocation21_spill] sm:$0xff] %v4008_v16  ;;  %v4010_v41 = vpop.f32.mrf.mxu0  ;;  %v4012_v49 = vpop.f32.mrf.mxu1 }
 0x23c   :  { %v4014_v2 = vpop.f32.mrf.mxu2  ;;  %v1805_v3 = vadd.f32 %v3947_v31, %v1746_v4 }
 0x23e   :  { %2137 = vmatmul.f32.gmra.mxu0 %v4481_v45  ;;  %2196 = vmatmul.f32.gmra.mxu1 %v3305_v61  ;;  %v4493_v45 = vld [vmem:[#allocation13_spill] sm:$0xff] }
 0x23f   :  { %2306 = vmatmul.f32.gmra.mxu3 %v4483_v57 }
 0x240   :  { %2256 = vmatmul.f32.gmra.mxu2 %v4483_v57 }
 0x242   :  { %v4020_v22 = vpop.f32.mrf.mxu3 }
 0x243   :  { %4491 = vst [vmem:[#allocation23_spill] sm:$0xff] %v4020_v22  ;;  %v4022_v62 = vpop.f32.mrf.mxu0  ;;  %v4024_v16 = vpop.f32.mrf.mxu1 }
 0x244   :  { %v4028_v35 = vpop.f32.mrf.mxu2 }
 0x245   :  { %4492 = vst [vmem:[#allocation20_spill] sm:$0xff] %v4028_v35 }
 0x246   :  { %2142 = vmatmul.f32.gmra.mxu0 %v4484_v58  ;;  %2202 = vmatmul.f32.gmra.mxu1 %v4493_v45  ;;  %v4494_v58 = vld [vmem:[#allocation17_spill] sm:$0xff]  ;;  %v4495_v45 = vld [vmem:[#allocation6_spill] sm:$0xff] }
 0x247   :  { %2310 = vmatmul.f32.gmra.mxu3 %v4486_v56 }
 0x248   :  { %2260 = vmatmul.f32.gmra.mxu2 %v4486_v56  ;;  %v1628_v56 = vadd.f32 %v3961_v19, %v3512_v1 }
 0x24a   :  { %v4035_v12 = vpop.f32.mrf.mxu3 }
 0x24b   :  { %v4037_v57 = vpop.f32.mrf.mxu1  ;;  %v1870_v22 = vpop.f32.mrf.mxu0 }
 0x24c   :  { %v4042_v35 = vpop.f32.mrf.mxu2  ;;  %v1871_v24 = vadd.f32 %v1870_v22, %v1805_v3  ;;  %v1702_v22 = vadd.f32 %v3975_v18, %v1628_v56 }
 0x24e   :  { %2208 = vmatmul.f32.gmra.mxu1 %v4494_v58  ;;  %2336 = vmatmul.f32.vlgmr.msrb.gmra.mxu0 %v4495_v45  ;;  %v1751_v45 = vadd.f32 %v3965_v28, %v1698_v63  ;;  %v1756_v28 = vadd.f32 %v3977_v59, %v1702_v22  ;;  %v1652_v22 = vadd.f32 %v3997_v26, %v3561_v0 }
 0x24f   :  { %2529 = vmatmul.f32.vlgmr.msrb.gmra.mxu3 %v4489_v27  ;;  %2830 = vmatpush.msrb.mxu0 %v2775_v25 }
 0x250   :  { %2470 = vmatmul.f32.vlgmr.msrb.gmra.mxu2 %v3201_v10  ;;  %3006 = vmatpush.msrb.mxu3 %v2692_v48 }
 0x251   :  { %2956 = vmatpush.msrb.mxu2 %v2776_v32  ;;  %v1811_v32 = vadd.f32 %v3959_v7, %v1751_v45  ;;  %v1817_v45 = vadd.f32 %v3971_v39, %v1756_v28 }
 0x252   :  { %v4050_v34 = vpop.f32.mrf.mxu3 }
 0x253   :  { %v1874_v40 = vpop.f32.mrf.mxu0  ;;  %v1920_v44 = vpop.f32.mrf.mxu1 }
 0x254   :  { %v1921_v27 = vadd.f32 %v1920_v44, %v1871_v24  ;;  %v4055_v25 = vpop.f32.mrf.mxu2  ;;  %v1875_v4 = vadd.f32 %v1874_v40, %v1811_v32 }
 0x256   :  { %3044 = vst [vmem:[#allocation2 + $0x20] sm:$0xff] %v1921_v27  ;;  %2344 = vmatmul.f32.gmra.mxu0 %v3239_v36  ;;  %2418 = vmatmul.f32.vlgmr.msrb.gmra.mxu1 %v3190_v5  ;;  %v1636_v27 = vadd.f32 %v3973_v42, %v3531_v8 }
 0x257   :  { %2535 = vmatmul.f32.gmra.mxu3 %v3218_v20  ;;  %2888 = vmatpush.msrb.mxu1 %v2692_v48  ;;  %v1644_v48 = vadd.f32 %v3985_v17, %v3542_v23 }
 0x258   :  { %2475 = vmatmul.f32.gmra.mxu2 %v3204_v11  ;;  %v1706_v56 = vadd.f32 %v3987_v30, %v1636_v27 }
 0x259   :  { %v1710_v30 = vadd.f32 %v3999_v13, %v1644_v48  ;;  %v1714_v13 = vadd.f32 %v4012_v49, %v1652_v22  ;;  %v4498_v49 = vld [vmem:[#allocation21_spill] sm:$0xff] }
 0x25a   :  { %v4063_v31 = vpop.f32.mrf.mxu3  ;;  %v1761_v63 = vadd.f32 %v3989_v52, %v1706_v56 }
 0x25b   :  { %v1878_v19 = vpop.f32.mrf.mxu0  ;;  %v1924_v15 = vpop.f32.mrf.mxu1 }
 0x25c   :  { %v1925_v9 = vadd.f32 %v1924_v15, %v1875_v4  ;;  %v4068_v3 = vpop.f32.mrf.mxu2  ;;  %v1879_v7 = vadd.f32 %v1878_v19, %v1817_v45  ;;  %v1823_v39 = vadd.f32 %v3983_v33, %v1761_v63  ;;  %v1766_v4 = vadd.f32 %v4001_v55, %v1710_v30  ;;  %v4499_v63 = vld [vmem:[#allocation9_spill] sm:$0xff]  ;;  %v4500_v30 = vld [vmem:[#allocation24_spill] sm:$0xff] }
 0x25d   :  { %v1771_v45 = vadd.f32 %v4014_v2, %v1714_v13  ;;  %v4505_v13 = vld [vmem:[#allocation23_spill] sm:$0xff] }
 0x25e   :  { %3052 = vst [vmem:[#allocation2 + $0x60] sm:$0xff] %v1925_v9  ;;  %2352 = vmatmul.f32.gmra.mxu0 %v3262_v46  ;;  %2422 = vmatmul.f32.gmra.mxu1 %v3192_v6  ;;  %v1829_v33 = vadd.f32 %v3995_v50, %v1766_v4  ;;  %v1660_v9 = vadd.f32 %v4010_v41, %v3576_v14  ;;  %v4497_v50 = vld [vmem:[#allocation7_spill] sm:$0xff] }
 0x25f   :  { %2541 = vmatmul.f32.gmra.mxu3 %v3242_v37 }
 0x260   :  { %2480 = vmatmul.f32.gmra.mxu2 %v3232_v29  ;;  %v1718_v48 = vadd.f32 %v4024_v16, %v1660_v9  ;;  %v4504_v16 = vld [vmem:[#allocation13_spill] sm:$0xff] }
 0x262   :  { %v4076_v42 = vpop.f32.mrf.mxu3 }
 0x263   :  { %v1882_v18 = vpop.f32.mrf.mxu0  ;;  %v1928_v59 = vpop.f32.mrf.mxu1 }
 0x264   :  { %v1929_v24 = vadd.f32 %v1928_v59, %v1879_v7  ;;  %v4081_v40 = vpop.f32.mrf.mxu2  ;;  %v1883_v44 = vadd.f32 %v1882_v18, %v1823_v39  ;;  %v4496_v18 = vld [vmem:[#allocation12_spill] sm:$0xff]  ;;  %v1835_v59 = vadd.f32 %v4498_v49, %v1771_v45 }
 0x266   :  { %3060 = vst [vmem:[#allocation2 + $0xa0] sm:$0xff] %v1929_v24  ;;  %2360 = vmatmul.f32.gmra.mxu0 %v3282_v53  ;;  %2426 = vmatmul.f32.gmra.mxu1 %v3220_v21 }
 0x267   :  { %2547 = vmatmul.f32.gmra.mxu3 %v3265_v47 }
 0x268   :  { %2485 = vmatmul.f32.gmra.mxu2 %v3254_v43 }
 0x26a   :  { %v4089_v17 = vpop.f32.mrf.mxu3 }
 0x26b   :  { %v1886_v52 = vpop.f32.mrf.mxu0  ;;  %v1932_v32 = vpop.f32.mrf.mxu1 }
 0x26c   :  { %v1933_v19 = vadd.f32 %v1932_v32, %v1883_v44  ;;  %v4094_v15 = vpop.f32.mrf.mxu2  ;;  %v1887_v27 = vadd.f32 %v1886_v52, %v1829_v33  ;;  %v1668_v44 = vadd.f32 %v4022_v62, %v4500_v30  ;;  %v4501_v52 = vld [vmem:[#allocation20_spill] sm:$0xff] }
 0x26d   :  { %v1776_v32 = vadd.f32 %v4501_v52, %v1718_v48  ;;  %v4503_v33 = vld [vmem:[#allocation8_spill] sm:$0xff] }
 0x26e   :  { %3068 = vst [vmem:[#allocation2 + $0xe0] sm:$0xff] %v1933_v19  ;;  %2368 = vmatmul.f32.gmra.mxu0 %v3302_v60  ;;  %2430 = vmatmul.f32.gmra.mxu1 %v3244_v38  ;;  %v4502_v19 = vld [vmem:[#allocation16_spill] sm:$0xff] }
 0x26f   :  { %2553 = vmatmul.f32.gmra.mxu3 %v3285_v54 }
 0x270   :  { %2490 = vmatmul.f32.gmra.mxu2 %v3277_v51 }
 0x272   :  { %v4102_v26 = vpop.f32.mrf.mxu3 }
 0x273   :  { %v1890_v55 = vpop.f32.mrf.mxu0  ;;  %v1936_v28 = vpop.f32.mrf.mxu1 }
 0x274   :  { %v1937_v56 = vadd.f32 %v1936_v28, %v1887_v27  ;;  %v4107_v7 = vpop.f32.mrf.mxu2  ;;  %v1891_v24 = vadd.f32 %v1890_v55, %v1835_v59  ;;  %v1841_v27 = vadd.f32 %v4505_v13, %v1776_v32  ;;  %v1722_v55 = vadd.f32 %v4037_v57, %v1668_v44  ;;  %v4506_v28 = vld [vmem:[#allocation11_spill] sm:$0xff] }
 0x275   :  { %v4509_v44 = vld [vmem:[#allocation15_spill] sm:$0xff] }
 0x276   :  { %3076 = vst [vmem:[#allocation2 + $0x120] sm:$0xff] %v1937_v56  ;;  %2376 = vmatmul.f32.gmra.mxu0 %v4496_v18  ;;  %2434 = vmatmul.f32.gmra.mxu1 %v4497_v50  ;;  %v1781_v49 = vadd.f32 %v4042_v35, %v1722_v55  ;;  %v4510_v35 = vld [vmem:[#allocation19_spill] sm:$0xff] }
 0x277   :  { %2559 = vmatmul.f32.gmra.mxu3 %v3305_v61  ;;  %v1975_v13 = vadd.f32 %v4055_v25, %v4510_v35 }
 0x278   :  { %2495 = vmatmul.f32.gmra.mxu2 %v4499_v63  ;;  %v1847_v57 = vadd.f32 %v4035_v12, %v1781_v49 }
 0x279   :  { %v2057_v12 = vadd.f32 %v4050_v34, %v1975_v13 }
 0x27a   :  { %v4115_v41 = vpop.f32.mrf.mxu3 }
 0x27b   :  { %v1894_v2 = vpop.f32.mrf.mxu0  ;;  %v1940_v39 = vpop.f32.mrf.mxu1 }
 0x27c   :  { %v1941_v22 = vadd.f32 %v1940_v39, %v1891_v24  ;;  %v4120_v4 = vpop.f32.mrf.mxu2  ;;  %v1895_v9 = vadd.f32 %v1894_v2, %v1841_v27  ;;  %v4507_v24 = vld [vmem:[#allocation18_spill] sm:$0xff] }
 0x27d   :  { %v4508_v39 = vld [vmem:[#allocation10_spill] sm:$0xff] }
 0x27e   :  { %3084 = vst [vmem:[#allocation2 + $0x160] sm:$0xff] %v1941_v22  ;;  %2384 = vmatmul.f32.gmra.mxu0 %v4502_v19  ;;  %2438 = vmatmul.f32.gmra.mxu1 %v4503_v33 }
 0x27f   :  { %2565 = vmatmul.f32.gmra.mxu3 %v4504_v16 }
 0x280   :  { %2500 = vmatmul.f32.gmra.mxu2 %v4506_v28 }
 0x282   :  { %v4128_v62 = vpop.f32.mrf.mxu3 }
 0x283   :  { %v1898_v45 = vpop.f32.mrf.mxu0  ;;  %v1944_v56 = vpop.f32.mrf.mxu1 }
 0x284   :  { %v1945_v59 = vadd.f32 %v1944_v56, %v1895_v9  ;;  %v4131_v48 = vpop.f32.mrf.mxu2  ;;  %v1899_v2 = vadd.f32 %v1898_v45, %v1847_v57  ;;  %v4511_v9 = vld [vmem:[#allocation14_spill] sm:$0xff] }
 0x285   :  { %v4512_v45 = vld [vmem:[#allocation6_spill] sm:$0xff] }
 0x286   :  { %3092 = vst [vmem:[#allocation2 + $0x1a0] sm:$0xff] %v1945_v59  ;;  %2392 = vmatmul.f32.gmra.mxu0 %v4507_v24  ;;  %2442 = vmatmul.f32.gmra.mxu1 %v4508_v39 }
 0x287   :  { %2571 = vmatmul.f32.gmra.mxu3 %v4494_v58  ;;  %v4513_v58 = vld [vmem:[#allocation22_spill] sm:$0xff] }
 0x288   :  { %2505 = vmatmul.f32.gmra.mxu2 %v4509_v44  ;;  %v1983_v25 = vadd.f32 %v4068_v3, %v4513_v58  ;;  %v1991_v3 = vadd.f32 %v4081_v40, %v3512_v1  ;;  %v1999_v40 = vadd.f32 %v4094_v15, %v3531_v8  ;;  %v2007_v15 = vadd.f32 %v4107_v7, %v3542_v23 }
 0x289   :  { %v2015_v7 = vadd.f32 %v4120_v4, %v3561_v0  ;;  %v2023_v4 = vadd.f32 %v4131_v48, %v3576_v14 }
 0x28a   :  { %v4138_v52 = vpop.f32.mrf.mxu3  ;;  %v2061_v34 = vadd.f32 %v4063_v31, %v1983_v25  ;;  %v2065_v31 = vadd.f32 %v4076_v42, %v1991_v3  ;;  %v2069_v42 = vadd.f32 %v4089_v17, %v1999_v40  ;;  %v2073_v17 = vadd.f32 %v4102_v26, %v2007_v15 }
 0x28b   :  { %v1948_v32 = vpop.f32.mrf.mxu1  ;;  %v2108_v22 = vpop.f32.mrf.mxu0  ;;  %v2077_v26 = vadd.f32 %v4115_v41, %v2015_v7  ;;  %v2081_v41 = vadd.f32 %v4128_v62, %v2023_v4 }
 0x28c   :  { %v1949_v27 = vadd.f32 %v1948_v32, %v1899_v2  ;;  %v4142_v55 = vpop.f32.mrf.mxu2  ;;  %v2109_v56 = vadd.f32 %v2108_v22, %v2057_v12 }
 0x28d   :  { %v2031_v48 = vadd.f32 %v4142_v55, %v4500_v30 }
 0x28e   :  { %3100 = vst [vmem:[#allocation2 + $0x1e0] sm:$0xff] %v1949_v27  ;;  %2446 = vmatmul.f32.gmra.mxu1 %v4511_v9  ;;  %2595 = vmatmul.f32.vlgmr.msra.gmra.mxu0 %v3190_v5 }
 0x28f   :  { %2781 = vmatmul.f32.vlgmr.msra.gmra.mxu3 %v3190_v5  ;;  %v2085_v62 = vadd.f32 %v4138_v52, %v2031_v48 }
 0x290   :  { %2699 = vmatmul.f32.vlgmr.msra.gmra.mxu2 %v4512_v45 }
 0x292   :  { %v2283_v49 = vpop.f32.mrf.mxu3 }
 0x293   :  { %v2113_v59 = vpop.f32.mrf.mxu0  ;;  %v2167_v57 = vpop.f32.mrf.mxu1 }
 0x294   :  { %v2168_v2 = vadd.f32 %v2167_v57, %v2109_v56  ;;  %v2233_v32 = vpop.f32.mrf.mxu2  ;;  %v2114_v22 = vadd.f32 %v2113_v59, %v2061_v34 }
 0x296   :  { %v2234_v27 = vadd.f32 %v2233_v32, %v2168_v2  ;;  %2599 = vmatmul.f32.gmra.mxu0 %v3192_v6  ;;  %2645 = vmatmul.f32.vlgmr.msra.gmra.mxu1 %v3190_v5 }
 0x297   :  { %2785 = vmatmul.f32.gmra.mxu3 %v3192_v6 }
 0x298   :  { %v2284_v13 = vadd.f32 %v2283_v49, %v2234_v27  ;;  %2707 = vmatmul.f32.gmra.mxu2 %v3239_v36 }
 0x29a   :  { %3045 = vst [vmem:[#allocation2 + $0x28] sm:$0xff] %v2284_v13  ;;  %v2287_v12 = vpop.f32.mrf.mxu3 }
 0x29b   :  { %v2118_v45 = vpop.f32.mrf.mxu0  ;;  %v2173_v16 = vpop.f32.mrf.mxu1 }
 0x29c   :  { %v2174_v56 = vadd.f32 %v2173_v16, %v2114_v22  ;;  %v2237_v57 = vpop.f32.mrf.mxu2  ;;  %v2119_v49 = vadd.f32 %v2118_v45, %v2065_v31 }
 0x29e   :  { %v2238_v2 = vadd.f32 %v2237_v57, %v2174_v56  ;;  %2603 = vmatmul.f32.gmra.mxu0 %v3220_v21  ;;  %2649 = vmatmul.f32.gmra.mxu1 %v3192_v6 }
 0x29f   :  { %2789 = vmatmul.f32.gmra.mxu3 %v3220_v21 }
 0x2a0   :  { %v2288_v36 = vadd.f32 %v2287_v12, %v2238_v2  ;;  %2715 = vmatmul.f32.gmra.mxu2 %v3262_v46 }
 0x2a2   :  { %3053 = vst [vmem:[#allocation2 + $0x68] sm:$0xff] %v2288_v36  ;;  %v2291_v59 = vpop.f32.mrf.mxu3 }
 0x2a3   :  { %v2123_v25 = vpop.f32.mrf.mxu0  ;;  %v2179_v32 = vpop.f32.mrf.mxu1 }
 0x2a4   :  { %v2180_v16 = vadd.f32 %v2179_v32, %v2119_v49  ;;  %v2241_v27 = vpop.f32.mrf.mxu2  ;;  %v2124_v13 = vadd.f32 %v2123_v25, %v2069_v42 }
 0x2a6   :  { %v2242_v34 = vadd.f32 %v2241_v27, %v2180_v16  ;;  %2607 = vmatmul.f32.gmra.mxu0 %v3244_v38  ;;  %2653 = vmatmul.f32.gmra.mxu1 %v3220_v21 }
 0x2a7   :  { %2793 = vmatmul.f32.gmra.mxu3 %v3244_v38 }
 0x2a8   :  { %v2292_v46 = vadd.f32 %v2291_v59, %v2242_v34  ;;  %2723 = vmatmul.f32.gmra.mxu2 %v3282_v53 }
 0x2aa   :  { %3061 = vst [vmem:[#allocation2 + $0xa8] sm:$0xff] %v2292_v46  ;;  %v2295_v22 = vpop.f32.mrf.mxu3 }
 0x2ab   :  { %v2128_v12 = vpop.f32.mrf.mxu0  ;;  %v2185_v45 = vpop.f32.mrf.mxu1 }
 0x2ac   :  { %v2186_v3 = vadd.f32 %v2185_v45, %v2124_v13  ;;  %v2245_v56 = vpop.f32.mrf.mxu2  ;;  %v2129_v2 = vadd.f32 %v2128_v12, %v2073_v17 }
 0x2ae   :  { %v2246_v57 = vadd.f32 %v2245_v56, %v2186_v3  ;;  %2611 = vmatmul.f32.gmra.mxu0 %v4497_v50  ;;  %2657 = vmatmul.f32.gmra.mxu1 %v3244_v38 }
 0x2af   :  { %2797 = vmatmul.f32.gmra.mxu3 %v4497_v50 }
 0x2b0   :  { %v2296_v53 = vadd.f32 %v2295_v22, %v2246_v57  ;;  %2731 = vmatmul.f32.gmra.mxu2 %v3302_v60 }
 0x2b2   :  { %3069 = vst [vmem:[#allocation2 + $0xe8] sm:$0xff] %v2296_v53  ;;  %v2299_v31 = vpop.f32.mrf.mxu3 }
 0x2b3   :  { %v2133_v36 = vpop.f32.mrf.mxu0  ;;  %v2191_v49 = vpop.f32.mrf.mxu1 }
 0x2b4   :  { %v2192_v59 = vadd.f32 %v2191_v49, %v2129_v2  ;;  %v2249_v25 = vpop.f32.mrf.mxu2  ;;  %v2134_v40 = vadd.f32 %v2133_v36, %v2077_v26 }
 0x2b6   :  { %v2250_v32 = vadd.f32 %v2249_v25, %v2192_v59  ;;  %2615 = vmatmul.f32.gmra.mxu0 %v4503_v33  ;;  %2661 = vmatmul.f32.gmra.mxu1 %v4497_v50 }
 0x2b7   :  { %2801 = vmatmul.f32.gmra.mxu3 %v4503_v33 }
 0x2b8   :  { %v2300_v60 = vadd.f32 %v2299_v31, %v2250_v32  ;;  %2739 = vmatmul.f32.gmra.mxu2 %v4496_v18  ;;  %v4514_v32 = vld [vmem:[#allocation5_spill] sm:$0xff] }
 0x2ba   :  { %3077 = vst [vmem:[#allocation2 + $0x128] sm:$0xff] %v2300_v60  ;;  %v2303_v16 = vpop.f32.mrf.mxu3 }
 0x2bb   :  { %v2138_v27 = vpop.f32.mrf.mxu0  ;;  %v2197_v34 = vpop.f32.mrf.mxu1 }
 0x2bc   :  { %v2198_v42 = vadd.f32 %v2197_v34, %v2134_v40  ;;  %v2253_v46 = vpop.f32.mrf.mxu2  ;;  %v2139_v22 = vadd.f32 %v2138_v27, %v2081_v41 }
 0x2be   :  { %v2254_v13 = vadd.f32 %v2253_v46, %v2198_v42  ;;  %2619 = vmatmul.f32.gmra.mxu0 %v4508_v39  ;;  %2665 = vmatmul.f32.gmra.mxu1 %v4503_v33 }
 0x2bf   :  { %2805 = vmatmul.f32.gmra.mxu3 %v4508_v39 }
 0x2c0   :  { %v2304_v18 = vadd.f32 %v2303_v16, %v2254_v13  ;;  %2747 = vmatmul.f32.gmra.mxu2 %v4502_v19  ;;  %v4515_v13 = vld [vmem:[#allocation13_spill] sm:$0xff] }
 0x2c2   :  { %3085 = vst [vmem:[#allocation2 + $0x168] sm:$0xff] %v2304_v18  ;;  %v2307_v12 = vpop.f32.mrf.mxu3 }
 0x2c3   :  { %v2143_v45 = vpop.f32.mrf.mxu0  ;;  %v2203_v15 = vpop.f32.mrf.mxu1 }
 0x2c4   :  { %v2204_v3 = vadd.f32 %v2203_v15, %v2139_v22  ;;  %v2257_v56 = vpop.f32.mrf.mxu2  ;;  %v2144_v17 = vadd.f32 %v2143_v45, %v2085_v62  ;;  %v4516_v45 = vld [vmem:[#allocation17_spill] sm:$0xff] }
 0x2c6   :  { %v2258_v57 = vadd.f32 %v2257_v56, %v2204_v3  ;;  %2623 = vmatmul.f32.gmra.mxu0 %v4511_v9  ;;  %2669 = vmatmul.f32.gmra.mxu1 %v4508_v39 }
 0x2c7   :  { %2809 = vmatmul.f32.gmra.mxu3 %v4511_v9 }
 0x2c8   :  { %v2308_v19 = vadd.f32 %v2307_v12, %v2258_v57  ;;  %2755 = vmatmul.f32.gmra.mxu2 %v4507_v24 }
 0x2ca   :  { %3093 = vst [vmem:[#allocation2 + $0x1a8] sm:$0xff] %v2308_v19  ;;  %v2311_v53 = vpop.f32.mrf.mxu3 }
 0x2cb   :  { %v2209_v2 = vpop.f32.mrf.mxu1  ;;  %v2337_v31 = vpop.f32.mrf.mxu0 }
 0x2cc   :  { %v2210_v55 = vadd.f32 %v2209_v2, %v2144_v17  ;;  %v2261_v36 = vpop.f32.mrf.mxu2  ;;  %v2338_v42 = vadd.f32 %v2337_v31, %v4510_v35 }
 0x2ce   :  { %v2262_v49 = vadd.f32 %v2261_v36, %v2210_v55  ;;  %2673 = vmatmul.f32.gmra.mxu1 %v4511_v9  ;;  %2833 = vmatmul.f32.vlgmr.msrb.gmra.mxu0 %v3201_v10 }
 0x2cf   :  { %3008 = vmatmul.f32.vlgmr.msrb.gmra.mxu3 %v3190_v5 }
 0x2d0   :  { %v2312_v7 = vadd.f32 %v2311_v53, %v2262_v49  ;;  %2958 = vmatmul.f32.vlgmr.msrb.gmra.mxu2 %v3190_v5 }
 0x2d2   :  { %3101 = vst [vmem:[#allocation2 + $0x1e8] sm:$0xff] %v2312_v7  ;;  %v4202_v52 = vpop.f32.mrf.mxu3 }
 0x2d3   :  { %v2345_v24 = vpop.f32.mrf.mxu0  ;;  %v2419_v59 = vpop.f32.mrf.mxu1 }
 0x2d4   :  { %v2471_v25 = vpop.f32.mrf.mxu2  ;;  %v2346_v18 = vadd.f32 %v2345_v24, %v4513_v58 }
 0x2d6   :  { %2838 = vmatmul.f32.gmra.mxu0 %v3204_v11  ;;  %2892 = vmatmul.f32.vlgmr.msrb.gmra.mxu1 %v4514_v32 }
 0x2d7   :  { %3012 = vmatmul.f32.gmra.mxu3 %v3192_v6 }
 0x2d8   :  { %2962 = vmatmul.f32.gmra.mxu2 %v3192_v6 }
 0x2da   :  { %v4208_v10 = vpop.f32.mrf.mxu3 }
 0x2db   :  { %v2353_v26 = vpop.f32.mrf.mxu0  ;;  %v2423_v60 = vpop.f32.mrf.mxu1 }
 0x2dc   :  { %v2476_v40 = vpop.f32.mrf.mxu2  ;;  %v2424_v15 = vadd.f32 %v2423_v60, %v2346_v18  ;;  %v2354_v57 = vadd.f32 %v2353_v26, %v3512_v1 }
 0x2de   :  { %2843 = vmatmul.f32.gmra.mxu0 %v3232_v29  ;;  %2898 = vmatmul.f32.gmra.mxu1 %v3218_v20  ;;  %v2477_v62 = vadd.f32 %v2476_v40, %v2424_v15 }
 0x2df   :  { %3016 = vmatmul.f32.gmra.mxu3 %v3220_v21 }
 0x2e0   :  { %2966 = vmatmul.f32.gmra.mxu2 %v3220_v21  ;;  %v2537_v53 = vadd.f32 %v4208_v10, %v2477_v62 }
 0x2e2   :  { %v4214_v5 = vpop.f32.mrf.mxu3 }
 0x2e3   :  { %v4216_v11 = vpop.f32.mrf.mxu0  ;;  %v2427_v16 = vpop.f32.mrf.mxu1 }
 0x2e4   :  { %v4218_v27 = vpop.f32.mrf.mxu2  ;;  %v2428_v2 = vadd.f32 %v2427_v16, %v2354_v57  ;;  %v2362_v7 = vadd.f32 %v4216_v11, %v3531_v8 }
 0x2e6   :  { %2848 = vmatmul.f32.gmra.mxu0 %v3254_v43  ;;  %2904 = vmatmul.f32.gmra.mxu1 %v3242_v37 }
 0x2e7   :  { %3020 = vmatmul.f32.gmra.mxu3 %v3244_v38 }
 0x2e8   :  { %2970 = vmatmul.f32.gmra.mxu2 %v3244_v38 }
 0x2ea   :  { %v4224_v6 = vpop.f32.mrf.mxu3 }
 0x2eb   :  { %v4226_v20 = vpop.f32.mrf.mxu0  ;;  %v2431_v21 = vpop.f32.mrf.mxu1 }
 0x2ec   :  { %v4228_v29 = vpop.f32.mrf.mxu2  ;;  %v2432_v32 = vadd.f32 %v2431_v21, %v2362_v7  ;;  %v2370_v16 = vadd.f32 %v4226_v20, %v3542_v23 }
 0x2ee   :  { %2853 = vmatmul.f32.gmra.mxu0 %v3277_v51  ;;  %2910 = vmatmul.f32.gmra.mxu1 %v3265_v47 }
 0x2ef   :  { %3024 = vmatmul.f32.gmra.mxu3 %v4497_v50 }
 0x2f0   :  { %2974 = vmatmul.f32.gmra.mxu2 %v4497_v50 }
 0x2f2   :  { %v4234_v37 = vpop.f32.mrf.mxu3 }
 0x2f3   :  { %v4236_v43 = vpop.f32.mrf.mxu0  ;;  %v4238_v38 = vpop.f32.mrf.mxu1 }
 0x2f4   :  { %v4240_v34 = vpop.f32.mrf.mxu2 }
 0x2f6   :  { %2858 = vmatmul.f32.gmra.mxu0 %v4499_v63  ;;  %2916 = vmatmul.f32.gmra.mxu1 %v3285_v54 }
 0x2f7   :  { %3028 = vmatmul.f32.gmra.mxu3 %v4503_v33 }
 0x2f8   :  { %2978 = vmatmul.f32.gmra.mxu2 %v4503_v33 }
 0x2fa   :  { %v4246_v47 = vpop.f32.mrf.mxu3 }
 0x2fb   :  { %v4248_v51 = vpop.f32.mrf.mxu0  ;;  %v4250_v50 = vpop.f32.mrf.mxu1 }
 0x2fc   :  { %v4252_v4 = vpop.f32.mrf.mxu2 }
 0x2fe   :  { %2863 = vmatmul.f32.gmra.mxu0 %v4506_v28  ;;  %2922 = vmatmul.f32.gmra.mxu1 %v3305_v61  ;;  %v2420_v61 = vadd.f32 %v2419_v59, %v2338_v42  ;;  %v2487_v42 = vadd.f32 %v4228_v29, %v2432_v32 }
 0x2ff   :  { %3032 = vmatmul.f32.gmra.mxu3 %v4508_v39 }
 0x300   :  { %2982 = vmatmul.f32.gmra.mxu2 %v4508_v39  ;;  %v2472_v22 = vadd.f32 %v2471_v25, %v2420_v61  ;;  %v2436_v61 = vadd.f32 %v4238_v38, %v2370_v16 }
 0x302   :  { %v4258_v54 = vpop.f32.mrf.mxu3  ;;  %v2492_v20 = vadd.f32 %v4240_v34, %v2436_v61 }
 0x303   :  { %v4260_v63 = vpop.f32.mrf.mxu0  ;;  %v4262_v33 = vpop.f32.mrf.mxu1 }
 0x304   :  { %v4265_v46 = vpop.f32.mrf.mxu2 }
 0x306   :  { %2868 = vmatmul.f32.gmra.mxu0 %v4509_v44  ;;  %2928 = vmatmul.f32.gmra.mxu1 %v4515_v13  ;;  %v2531_v44 = vadd.f32 %v4202_v52, %v2472_v22  ;;  %v2482_v52 = vadd.f32 %v4218_v27, %v2428_v2  ;;  %v2549_v27 = vadd.f32 %v4224_v6, %v2487_v42 }
 0x307   :  { %3036 = vmatmul.f32.gmra.mxu3 %v4511_v9  ;;  %v2378_v22 = vadd.f32 %v4236_v43, %v3561_v0 }
 0x308   :  { %2986 = vmatmul.f32.gmra.mxu2 %v4511_v9  ;;  %v2543_v25 = vadd.f32 %v4214_v5, %v2482_v52 }
 0x309   :  { %v2440_v6 = vadd.f32 %v4250_v50, %v2378_v22 }
 0x30a   :  { %v4271_v28 = vpop.f32.mrf.mxu3 }
 0x30b   :  { %v4273_v39 = vpop.f32.mrf.mxu1  ;;  %v2596_v41 = vpop.f32.mrf.mxu0  ;;  %v2497_v43 = vadd.f32 %v4252_v4, %v2440_v6 }
 0x30c   :  { %v4276_v12 = vpop.f32.mrf.mxu2  ;;  %v2597_v48 = vadd.f32 %v2596_v41, %v2531_v44  ;;  %v2555_v44 = vadd.f32 %v4234_v37, %v2492_v20 }
 0x30d   :  { %v2561_v62 = vadd.f32 %v4246_v47, %v2497_v43 }
 0x30e   :  { %2934 = vmatmul.f32.gmra.mxu1 %v4516_v45 }
 0x312   :  { %v4280_v3 = vpop.f32.mrf.mxu3 }
 0x313   :  { %v2600_v56 = vpop.f32.mrf.mxu0  ;;  %v2646_v9 = vpop.f32.mrf.mxu1 }
 0x314   :  { %v2647_v19 = vadd.f32 %v2646_v9, %v2597_v48  ;;  %v4283_v17 = vpop.f32.mrf.mxu2  ;;  %v2601_v31 = vadd.f32 %v2600_v56, %v2537_v53  ;;  %v2386_v9 = vadd.f32 %v4248_v51, %v3576_v14 }
 0x316   :  { %3046 = vst [vmem:[#allocation2 + $0x30] sm:$0xff] %v2647_v19  ;;  %v2444_v37 = vadd.f32 %v4262_v33, %v2386_v9 }
 0x318   :  { %v2502_v51 = vadd.f32 %v4265_v46, %v2444_v37 }
 0x31a   :  { %v4286_v55 = vpop.f32.mrf.mxu3 }
 0x31b   :  { %v2604_v36 = vpop.f32.mrf.mxu0  ;;  %v2650_v49 = vpop.f32.mrf.mxu1 }
 0x31c   :  { %v2651_v24 = vadd.f32 %v2650_v49, %v2601_v31  ;;  %v4291_v59 = vpop.f32.mrf.mxu2  ;;  %v2605_v26 = vadd.f32 %v2604_v36, %v2543_v25  ;;  %v2394_v31 = vadd.f32 %v4260_v63, %v4500_v30  ;;  %v2567_v49 = vadd.f32 %v4258_v54, %v2502_v51 }
 0x31e   :  { %3054 = vst [vmem:[#allocation2 + $0x70] sm:$0xff] %v2651_v24  ;;  %v2448_v47 = vadd.f32 %v4273_v39, %v2394_v31  ;;  %v2701_v39 = vadd.f32 %v4283_v17, %v4510_v35 }
 0x320   :  { %v2507_v25 = vadd.f32 %v4276_v12, %v2448_v47  ;;  %v2783_v12 = vadd.f32 %v4280_v3, %v2701_v39 }
 0x322   :  { %v4294_v10 = vpop.f32.mrf.mxu3  ;;  %v2573_v63 = vadd.f32 %v4271_v28, %v2507_v25  ;;  %v2709_v28 = vadd.f32 %v4291_v59, %v4513_v58 }
 0x323   :  { %v2608_v60 = vpop.f32.mrf.mxu0  ;;  %v2654_v40 = vpop.f32.mrf.mxu1 }
 0x324   :  { %v2655_v11 = vadd.f32 %v2654_v40, %v2605_v26  ;;  %v4299_v13 = vpop.f32.mrf.mxu2  ;;  %v2609_v5 = vadd.f32 %v2608_v60, %v2549_v27  ;;  %v2787_v20 = vadd.f32 %v4286_v55, %v2709_v28 }
 0x325   :  { %v2717_v3 = vadd.f32 %v4299_v13, %v3512_v1 }
 0x326   :  { %3062 = vst [vmem:[#allocation2 + $0xb0] sm:$0xff] %v2655_v11 }
 0x327   :  { %v2791_v9 = vadd.f32 %v4294_v10, %v2717_v3 }
 0x32a   :  { %v4303_v21 = vpop.f32.mrf.mxu3 }
 0x32b   :  { %v2612_v41 = vpop.f32.mrf.mxu0  ;;  %v2658_v18 = vpop.f32.mrf.mxu1 }
 0x32c   :  { %v2659_v45 = vadd.f32 %v2658_v18, %v2609_v5  ;;  %v4308_v29 = vpop.f32.mrf.mxu2  ;;  %v2613_v15 = vadd.f32 %v2612_v41, %v2555_v44 }
 0x32e   :  { %3070 = vst [vmem:[#allocation2 + $0xf0] sm:$0xff] %v2659_v45 }
 0x332   :  { %v4312_v38 = vpop.f32.mrf.mxu3 }
 0x333   :  { %v2616_v48 = vpop.f32.mrf.mxu0  ;;  %v2662_v56 = vpop.f32.mrf.mxu1 }
 0x334   :  { %v2663_v57 = vadd.f32 %v2662_v56, %v2613_v15  ;;  %v4317_v34 = vpop.f32.mrf.mxu2  ;;  %v2617_v19 = vadd.f32 %v2616_v48, %v2561_v62  ;;  %v2725_v62 = vadd.f32 %v4308_v29, %v3531_v8 }
 0x336   :  { %3078 = vst [vmem:[#allocation2 + $0x130] sm:$0xff] %v2663_v57 }
 0x33a   :  { %v4321_v50 = vpop.f32.mrf.mxu3 }
 0x33b   :  { %v2620_v53 = vpop.f32.mrf.mxu0  ;;  %v2666_v2 = vpop.f32.mrf.mxu1 }
 0x33c   :  { %v2667_v36 = vadd.f32 %v2666_v2, %v2617_v19  ;;  %v4326_v4 = vpop.f32.mrf.mxu2  ;;  %v2621_v7 = vadd.f32 %v2620_v53, %v2567_v49  ;;  %v2795_v2 = vadd.f32 %v4303_v21, %v2725_v62 }
 0x33e   :  { %3086 = vst [vmem:[#allocation2 + $0x170] sm:$0xff] %v2667_v36  ;;  %v2733_v36 = vadd.f32 %v4317_v34, %v3542_v23 }
 0x342   :  { %v4330_v33 = vpop.f32.mrf.mxu3 }
 0x343   :  { %v2624_v52 = vpop.f32.mrf.mxu0  ;;  %v2670_v24 = vpop.f32.mrf.mxu1 }
 0x344   :  { %v2671_v32 = vadd.f32 %v2670_v24, %v2621_v7  ;;  %v4333_v26 = vpop.f32.mrf.mxu2  ;;  %v2625_v46 = vadd.f32 %v2624_v52, %v2573_v63  ;;  %v2799_v52 = vadd.f32 %v4312_v38, %v2733_v36 }
 0x345   :  { %v2749_v38 = vadd.f32 %v4333_v26, %v3576_v14 }
 0x346   :  { %3094 = vst [vmem:[#allocation2 + $0x1b0] sm:$0xff] %v2671_v32  ;;  %v2741_v32 = vadd.f32 %v4326_v4, %v3561_v0 }
 0x34a   :  { %v4336_v60 = vpop.f32.mrf.mxu3 }
 0x34b   :  { %v2674_v40 = vpop.f32.mrf.mxu1  ;;  %v2834_v54 = vpop.f32.mrf.mxu0 }
 0x34c   :  { %v2675_v16 = vadd.f32 %v2674_v40, %v2625_v46  ;;  %v4340_v42 = vpop.f32.mrf.mxu2  ;;  %v2835_v11 = vadd.f32 %v2834_v54, %v2783_v12  ;;  %v2803_v54 = vadd.f32 %v4321_v50, %v2741_v32 }
 0x34d   :  { %v2757_v50 = vadd.f32 %v4340_v42, %v4500_v30 }
 0x34e   :  { %3102 = vst [vmem:[#allocation2 + $0x1f0] sm:$0xff] %v2675_v16 }
 0x34f   :  { %v2811_v14 = vadd.f32 %v4336_v60, %v2757_v50 }
 0x352   :  { %v3009_v27 = vpop.f32.mrf.mxu3 }
 0x353   :  { %v2839_v61 = vpop.f32.mrf.mxu0  ;;  %v2893_v5 = vpop.f32.mrf.mxu1 }
 0x354   :  { %v2894_v41 = vadd.f32 %v2893_v5, %v2835_v11  ;;  %v2959_v18 = vpop.f32.mrf.mxu2  ;;  %v2840_v35 = vadd.f32 %v2839_v61, %v2787_v20  ;;  %v2807_v5 = vadd.f32 %v4330_v33, %v2749_v38 }
 0x356   :  { %v2960_v22 = vadd.f32 %v2959_v18, %v2894_v41 }
 0x358   :  { %v3010_v45 = vadd.f32 %v3009_v27, %v2960_v22 }
 0x35a   :  { %3047 = vst [vmem:[#allocation2 + $0x38] sm:$0xff] %v3010_v45  ;;  %v3013_v17 = vpop.f32.mrf.mxu3 }
 0x35b   :  { %v2844_v44 = vpop.f32.mrf.mxu0  ;;  %v2899_v6 = vpop.f32.mrf.mxu1 }
 0x35c   :  { %v2900_v15 = vadd.f32 %v2899_v6, %v2840_v35  ;;  %v2963_v48 = vpop.f32.mrf.mxu2  ;;  %v2845_v59 = vadd.f32 %v2844_v44, %v2791_v9 }
 0x35e   :  { %v2964_v56 = vadd.f32 %v2963_v48, %v2900_v15 }
 0x360   :  { %v3014_v58 = vadd.f32 %v3013_v17, %v2964_v56 }
 0x362   :  { %3055 = vst [vmem:[#allocation2 + $0x78] sm:$0xff] %v3014_v58  ;;  %v3017_v43 = vpop.f32.mrf.mxu3 }
 0x363   :  { %v2849_v57 = vpop.f32.mrf.mxu0  ;;  %v2905_v55 = vpop.f32.mrf.mxu1 }
 0x364   :  { %v2906_v37 = vadd.f32 %v2905_v55, %v2845_v59  ;;  %v2967_v19 = vpop.f32.mrf.mxu2  ;;  %v2850_v13 = vadd.f32 %v2849_v57, %v2795_v2 }
 0x366   :  { %v2968_v53 = vadd.f32 %v2967_v19, %v2906_v37 }
 0x368   :  { %v3018_v1 = vadd.f32 %v3017_v43, %v2968_v53 }
 0x36a   :  { %3063 = vst [vmem:[#allocation2 + $0xb8] sm:$0xff] %v3018_v1  ;;  %v3021_v31 = vpop.f32.mrf.mxu3 }
 0x36b   :  { %v2854_v51 = vpop.f32.mrf.mxu0  ;;  %v2911_v10 = vpop.f32.mrf.mxu1 }
 0x36c   :  { %v2912_v49 = vadd.f32 %v2911_v10, %v2850_v13  ;;  %v2971_v47 = vpop.f32.mrf.mxu2  ;;  %v2855_v29 = vadd.f32 %v2854_v51, %v2799_v52 }
 0x36e   :  { %v2972_v7 = vadd.f32 %v2971_v47, %v2912_v49 }
 0x370   :  { %v3022_v8 = vadd.f32 %v3021_v31, %v2972_v7 }
 0x372   :  { %3071 = vst [vmem:[#allocation2 + $0xf8] sm:$0xff] %v3022_v8  ;;  %v3025_v24 = vpop.f32.mrf.mxu3 }
 0x373   :  { %v2859_v25 = vpop.f32.mrf.mxu0  ;;  %v2917_v21 = vpop.f32.mrf.mxu1 }
 0x374   :  { %v2918_v63 = vadd.f32 %v2917_v21, %v2855_v29  ;;  %v2975_v46 = vpop.f32.mrf.mxu2  ;;  %v2860_v34 = vadd.f32 %v2859_v25, %v2803_v54 }
 0x376   :  { %v2976_v40 = vadd.f32 %v2975_v46, %v2918_v63 }
 0x378   :  { %v3026_v23 = vadd.f32 %v3025_v24, %v2976_v40 }
 0x37a   :  { %3079 = vst [vmem:[#allocation2 + $0x138] sm:$0xff] %v3026_v23  ;;  %v3029_v39 = vpop.f32.mrf.mxu3 }
 0x37b   :  { %v2923_v16 = vpop.f32.mrf.mxu1  ;;  %v2864_v27 = vpop.f32.mrf.mxu0 }
 0x37c   :  { %v2924_v12 = vadd.f32 %v2923_v16, %v2860_v34  ;;  %v2979_v11 = vpop.f32.mrf.mxu2  ;;  %v2865_v4 = vadd.f32 %v2864_v27, %v2807_v5 }
 0x37e   :  { %v2980_v61 = vadd.f32 %v2979_v11, %v2924_v12 }
 0x380   :  { %v3030_v0 = vadd.f32 %v3029_v39, %v2980_v61 }
 0x382   :  { %3087 = vst [vmem:[#allocation2 + $0x178] sm:$0xff] %v3030_v0  ;;  %v3033_v41 = vpop.f32.mrf.mxu3 }
 0x383   :  { %v2929_v28 = vpop.f32.mrf.mxu1  ;;  %v2869_v45 = vpop.f32.mrf.mxu0 }
 0x384   :  { %v2930_v18 = vadd.f32 %v2929_v28, %v2865_v4  ;;  %v2983_v22 = vpop.f32.mrf.mxu2  ;;  %v2870_v35 = vadd.f32 %v2869_v45, %v2811_v14 }
 0x386   :  { %v2984_v20 = vadd.f32 %v2983_v22, %v2930_v18 }
 0x388   :  { %v3034_v26 = vadd.f32 %v3033_v41, %v2984_v20 }
 0x38a   :  { %3095 = vst [vmem:[#allocation2 + $0x1b8] sm:$0xff] %v3034_v26  ;;  %v3037_v6 = vpop.f32.mrf.mxu3 }
 0x38b   :  { %v2935_v17 = vpop.f32.mrf.mxu1 }
 0x38c   :  { %v2936_v44 = vadd.f32 %v2935_v17, %v2870_v35  ;;  %v2987_v33 = vpop.f32.mrf.mxu2 }
 0x38e   :  { %v2988_v30 = vadd.f32 %v2987_v33, %v2936_v44 }
 0x390   :  { %v3038_v42 = vadd.f32 %v3037_v6, %v2988_v30 }
 0x392   :  { %3103 = vst [vmem:[#allocation2 + $0x1f8] sm:$0xff] %v3038_v42 }
 0x393   :  { %3116 = dma.vmem_to_hbm [thread:$0]  %s3109_s23, 8192, %s3111_s26, [#allocation3], %s3157_s27, %s3157_s27, %s3158_s28  }
 0x394   :  { %3153 = dma.done.wait [#allocation3], 8192  }
 0x395   :  { %3154 = vsyncadd [#allocation3], 4294959104 }
 0x396   :  { %3121 = vsyncpa [#allocation3], 1 }

</bundles_post_ra>
